<compile_context>
chip_gen: v7x
topology: tpu7x:2x2x1
jax: 0.10.0
libtpu: 0.0.40
codegen_flags: <defaults>
</compile_context>

<pallas_src>
import numpy as np

import jax
import jax.numpy as jnp
from jax.experimental import pallas as pl
from jax.experimental.pallas import tpu as pltpu


H1 = 28            # input spatial size (implied by fc1 = 16*4*4)
H2 = 12            # spatial size after pool1
C1, C2 = 6, 16     # conv channel counts
K = 5              # conv kernel size


def _net_kernel(x_ref, t1_ref, b1_ref, s1e_ref, s1o_ref, s1r_ref,
                t2_ref, b2_ref, s2e_ref, s2o_ref, s2r_ref,
                wf1_ref, bf1_ref, wf2_ref, bf2_ref, wf3_ref, bf3_ref,
                o_ref, a0, a1, a2, a3):
    f32 = jnp.float32
    R1 = x_ref.shape[0]          # B * 28
    B = R1 // H1
    R2 = B * H2                  # B * 12

    # Zero scratch so the padded rows (read by shifted loads for the last batch)
    # contribute finite zeros instead of uninitialized garbage.
    a0[...] = jnp.zeros_like(a0)
    a1[...] = jnp.zeros_like(a1)
    a2[...] = jnp.zeros_like(a2)
    a3[...] = jnp.zeros_like(a3)

    # ---------------- conv1 + bias + relu (5 row-shifted banded matmuls) ------------
    a0[0:R1, :] = x_ref[...]                                   # (B*28, 28)
    acc = jnp.dot(a0[0:R1, :], t1_ref[0], preferred_element_type=f32)
    for i in range(1, K):
        acc += jnp.dot(a0[i:i + R1, :], t1_ref[i], preferred_element_type=f32)
    a1[0:R1, :] = jnp.maximum(acc + b1_ref[...], 0.0)          # (B*28, 168)

    # ---------------- maxpool 2x2 #1 --------------------------------------------------
    mv = jnp.maximum(a1[0:R1, :], a1[1:R1 + 1, :])             # vertical pair max
    h1 = jnp.maximum(jnp.dot(mv, s1e_ref[...], preferred_element_type=f32),
                     jnp.dot(mv, s1o_ref[...], preferred_element_type=f32))  # (B*28, 72)
    a2[0:R2, :] = jnp.dot(s1r_ref[...], h1, preferred_element_type=f32)       # (B*12, 72)

    # ---------------- conv2 + bias + relu ---------------------------------------------
    acc = jnp.dot(a2[0:R2, :], t2_ref[0], preferred_element_type=f32)
    for i in range(1, K):
        acc += jnp.dot(a2[i:i + R2, :], t2_ref[i], preferred_element_type=f32)
    a3[0:R2, :] = jnp.maximum(acc + b2_ref[...], 0.0)          # (B*12, 192)

    # ---------------- maxpool 2x2 #2 --------------------------------------------------
    mv2 = jnp.maximum(a3[0:R2, :], a3[1:R2 + 1, :])
    h2 = jnp.maximum(jnp.dot(mv2, s2e_ref[...], preferred_element_type=f32),
                     jnp.dot(mv2, s2o_ref[...], preferred_element_type=f32))  # (B*12, 64)

    # ---------------- fc1 (NCHW flatten folded into wf1) ------------------------------
    z = jnp.dot(jnp.dot(s2r_ref[0], h2, preferred_element_type=f32),
                wf1_ref[0], preferred_element_type=f32)
    for ph in range(1, 4):
        rows = jnp.dot(s2r_ref[ph], h2, preferred_element_type=f32)   # (B, 64)
        z += jnp.dot(rows, wf1_ref[ph], preferred_element_type=f32)
    z = jnp.maximum(z + bf1_ref[...], 0.0)                     # (B, 120)

    # ---------------- fc2 --------------------------------------------------------------
    z = jnp.maximum(jnp.dot(z, wf2_ref[...], preferred_element_type=f32) + bf2_ref[...],
                    0.0)                                       # (B, 84)

    # ---------------- fc3 (padded to 128 lanes) ----------------------------------------
    o_ref[...] = jnp.dot(z, wf3_ref[...], preferred_element_type=f32) + bf3_ref[...]


def init_params(key):
    """Deterministic synthetic parameters with the PyTorch module's shapes."""
    ks = jax.random.split(key, 10)

    def u(k, shape, fan_in):
        bound = 1.0 / jnp.sqrt(fan_in)
        return jax.random.uniform(k, shape, jnp.float32, -bound, bound)

    return {
        "conv1_w": u(ks[0], (6, 1, 5, 5), 1 * 5 * 5),
        "conv1_b": u(ks[1], (6,), 1 * 5 * 5),
        "conv2_w": u(ks[2], (16, 6, 5, 5), 6 * 5 * 5),
        "conv2_b": u(ks[3], (16,), 6 * 5 * 5),
        "fc1_w": u(ks[4], (120, 256), 256),   # PyTorch Linear weight: (out, in)
        "fc1_b": u(ks[5], (120,), 256),
        "fc2_w": u(ks[6], (84, 120), 120),
        "fc2_b": u(ks[7], (84,), 120),
        "fc3_w": u(ks[8], (10, 84), 84),
        "fc3_b": u(ks[9], (10,), 84),
    }


def make_operands(p, batch):
    """One-time host-side preparation: banded conv matrices, pooling selection
    matrices, pre-transposed / permuted / padded fc weights."""
    f32 = np.float32
    B = batch

    w1 = np.asarray(p["conv1_w"], f32)
    b1 = np.asarray(p["conv1_b"], f32)
    w2 = np.asarray(p["conv2_w"], f32)
    b2 = np.asarray(p["conv2_b"], f32)
    f1w = np.asarray(p["fc1_w"], f32)
    f1b = np.asarray(p["fc1_b"], f32)
    f2w = np.asarray(p["fc2_w"], f32)
    f2b = np.asarray(p["fc2_b"], f32)
    f3w = np.asarray(p["fc3_w"], f32)
    f3b = np.asarray(p["fc3_b"], f32)

    # conv1 as 5 banded matmuls over the W axis: t1[i] maps 28 input cols -> 6*28 cols.
    t1 = np.zeros((K, H1, C1 * H1), f32)
    for i in range(K):
        for co in range(C1):
            for ow in range(H1):
                for j in range(K):
                    wi = ow + j
                    if wi < H1:
                        t1[i, wi, co * H1 + ow] = w1[co, 0, i, j]
    b1row = np.repeat(b1, H1)[None, :]                       # (1, 168)

    # conv2: t2[i] maps 6*12 input cols -> 16*12 cols.
    t2 = np.zeros((K, C1 * H2, C2 * H2), f32)
    for i in range(K):
        for co in range(C2):
            for c in range(C1):
                for ow in range(H2):
                    for j in range(K):
                        wi = ow + j
                        if wi < H2:
                            t2[i, c * H2 + wi, co * H2 + ow] = w2[co, c, i, j]
    b2row = np.repeat(b2, H2)[None, :]                       # (1, 192)

    # pool1: even/odd column selection (168 -> 72) and row downsample (B*28 -> B*12).
    s1e = np.zeros((C1 * H1, C1 * H2), f32)
    s1o = np.zeros((C1 * H1, C1 * H2), f32)
    for c in range(C1):
        for pw in range(H2):
            s1e[c * H1 + 2 * pw, c * H2 + pw] = 1.0
            s1o[c * H1 + 2 * pw + 1, c * H2 + pw] = 1.0
    s1r = np.zeros((B * H2, B * H1), f32)
    for b in range(B):
        for ph in range(H2):
            s1r[b * H2 + ph, b * H1 + 2 * ph] = 1.0

    # pool2: even/odd column selection (192 -> 64) and per-ph row selection (B*12 -> B).
    s2e = np.zeros((C2 * H2, C2 * 4), f32)
    s2o = np.zeros((C2 * H2, C2 * 4), f32)
    for c in range(C2):
        for pw in range(4):
            s2e[c * H2 + 2 * pw, c * 4 + pw] = 1.0
            s2o[c * H2 + 2 * pw + 1, c * 4 + pw] = 1.0
    s2r = np.zeros((4, B, B * H2), f32)
    for ph in range(4):
        for b in range(B):
            s2r[ph, b, b * H2 + 2 * ph] = 1.0

    # fc1 weight with torch's NCHW .view flatten (idx = c*16 + ph*4 + pw) folded in.
    wf1 = np.zeros((4, C2 * 4, 120), f32)
    for ph in range(4):
        for co in range(C2):
            for pw in range(4):
                wf1[ph, co * 4 + pw, :] = f1w[:, co * 16 + ph * 4 + pw]
    bf1 = f1b[None, :]

    wf2 = np.ascontiguousarray(f2w.T)                        # (120, 84)
    bf2 = f2b[None, :]

    # fc3 padded to 128 output lanes; wrapper slices back to 10.
    wf3 = np.zeros((84, 128), f32)
    wf3[:, :10] = f3w.T
    bf3 = np.zeros((1, 128), f32)
    bf3[0, :10] = f3b

    ops = (t1, b1row, s1e, s1o, s1r, t2, b2row, s2e, s2o, s2r,
           wf1, bf1, wf2, bf2, wf3, bf3)
    return tuple(jnp.asarray(a) for a in ops)


def net_forward(x, ops):
    """x: (B, 1, 28, 28) float32 -> (B, 10). Whole network in one pallas_call."""
    B = x.shape[0]
    R1, R2 = B * H1, B * H2
    x2d = x.reshape(R1, H1)                                  # free bitcast reshape

    vmem = pl.BlockSpec(memory_space=pltpu.MemorySpace.VMEM)
    out = pl.pallas_call(
        _net_kernel,
        out_shape=jax.ShapeDtypeStruct((B, 128), jnp.float32),
        in_specs=[vmem] * 17,
        out_specs=vmem,
        scratch_shapes=[
            pltpu.VMEM((R1 + K - 1, H1), jnp.float32),       # a0: padded input
            pltpu.VMEM((R1 + 1, C1 * H1), jnp.float32),      # a1: conv1 full grid
            pltpu.VMEM((R2 + K - 1, C1 * H2), jnp.float32),  # a2: pooled1
            pltpu.VMEM((R2 + 1, C2 * H2), jnp.float32),      # a3: conv2 full grid
        ],
    )(x2d, *ops)
    return out[:, :10]


if __name__ == "__main__":
    key = jax.random.PRNGKey(0)
    k_x, k_p = jax.random.split(key)
    x = jax.random.normal(k_x, (2, 1, 28, 28), dtype=jnp.float32)
    params = init_params(k_p)
    ops = make_operands(params, batch=2)

    out = jax.jit(net_forward)(x, ops)
    out = jax.block_until_ready(out)
    assert out.shape == (2, 10) and out.dtype == jnp.float32
    assert bool(jnp.all(jnp.isfinite(out)))
    print("KERNEL_OK")
</pallas_src>

<mosaic_0001>
module attributes {stable_mosaic.version = 11 : i64} {
  func.func @_net_kernel(%arg0: memref<56x28xf32, #tpu.memory_space<vmem>>, %arg1: memref<5x28x168xf32, #tpu.memory_space<vmem>>, %arg2: memref<1x168xf32, #tpu.memory_space<vmem>>, %arg3: memref<168x72xf32, #tpu.memory_space<vmem>>, %arg4: memref<168x72xf32, #tpu.memory_space<vmem>>, %arg5: memref<24x56xf32, #tpu.memory_space<vmem>>, %arg6: memref<5x72x192xf32, #tpu.memory_space<vmem>>, %arg7: memref<1x192xf32, #tpu.memory_space<vmem>>, %arg8: memref<192x64xf32, #tpu.memory_space<vmem>>, %arg9: memref<192x64xf32, #tpu.memory_space<vmem>>, %arg10: memref<4x2x24xf32, #tpu.memory_space<vmem>>, %arg11: memref<4x64x120xf32, #tpu.memory_space<vmem>>, %arg12: memref<1x120xf32, #tpu.memory_space<vmem>>, %arg13: memref<120x84xf32, #tpu.memory_space<vmem>>, %arg14: memref<1x84xf32, #tpu.memory_space<vmem>>, %arg15: memref<84x128xf32, #tpu.memory_space<vmem>>, %arg16: memref<1x128xf32, #tpu.memory_space<vmem>>, %arg17: memref<2x128xf32, #tpu.memory_space<vmem>>, %arg18: memref<60x28xf32, #tpu.memory_space<vmem>>, %arg19: memref<57x168xf32, #tpu.memory_space<vmem>>, %arg20: memref<28x72xf32, #tpu.memory_space<vmem>>, %arg21: memref<25x192xf32, #tpu.memory_space<vmem>>) attributes {dimension_semantics = [], scalar_prefetch = 0 : i64, scratch_operands = 4 : i64, tpu.core_type = #tpu.core_type<tc>} {
    %cst = arith.constant 0.000000e+00 : f32
    %0 = vector.broadcast %cst : f32 to vector<60x28xf32>
    %c0 = arith.constant 0 : index
    %c0_0 = arith.constant 0 : index
    %1 = vector.load %arg18[%c0, %c0_0] : memref<60x28xf32, #tpu.memory_space<vmem>>, vector<60x28xf32>
    tpu.vector_store %arg18[%c0, %c0_0], %0 {strides = array<i32>} : memref<60x28xf32, #tpu.memory_space<vmem>>, vector<60x28xf32>,
    %cst_1 = arith.constant 0.000000e+00 : f32
    %2 = vector.broadcast %cst_1 : f32 to vector<57x168xf32>
    %c0_2 = arith.constant 0 : index
    %c0_3 = arith.constant 0 : index
    %3 = vector.load %arg19[%c0_2, %c0_3] : memref<57x168xf32, #tpu.memory_space<vmem>>, vector<57x168xf32>
    tpu.vector_store %arg19[%c0_2, %c0_3], %2 {strides = array<i32>} : memref<57x168xf32, #tpu.memory_space<vmem>>, vector<57x168xf32>,
    %cst_4 = arith.constant 0.000000e+00 : f32
    %4 = vector.broadcast %cst_4 : f32 to vector<28x72xf32>
    %c0_5 = arith.constant 0 : index
    %c0_6 = arith.constant 0 : index
    %5 = vector.load %arg20[%c0_5, %c0_6] : memref<28x72xf32, #tpu.memory_space<vmem>>, vector<28x72xf32>
    tpu.vector_store %arg20[%c0_5, %c0_6], %4 {strides = array<i32>} : memref<28x72xf32, #tpu.memory_space<vmem>>, vector<28x72xf32>,
    %cst_7 = arith.constant 0.000000e+00 : f32
    %6 = vector.broadcast %cst_7 : f32 to vector<25x192xf32>
    %c0_8 = arith.constant 0 : index
    %c0_9 = arith.constant 0 : index
    %7 = vector.load %arg21[%c0_8, %c0_9] : memref<25x192xf32, #tpu.memory_space<vmem>>, vector<25x192xf32>
    tpu.vector_store %arg21[%c0_8, %c0_9], %6 {strides = array<i32>} : memref<25x192xf32, #tpu.memory_space<vmem>>, vector<25x192xf32>,
    %c0_10 = arith.constant 0 : index
    %c0_11 = arith.constant 0 : index
    %8 = vector.load %arg0[%c0_10, %c0_11] : memref<56x28xf32, #tpu.memory_space<vmem>>, vector<56x28xf32>
    %c0_12 = arith.constant 0 : index
    %c0_13 = arith.constant 0 : index
    %9 = vector.load %arg18[%c0_12, %c0_13] : memref<60x28xf32, #tpu.memory_space<vmem>>, vector<56x28xf32>
    tpu.vector_store %arg18[%c0_12, %c0_13], %8 {strides = array<i32>} : memref<60x28xf32, #tpu.memory_space<vmem>>, vector<56x28xf32>,
    %c0_14 = arith.constant 0 : index
    %c0_15 = arith.constant 0 : index
    %10 = vector.load %arg18[%c0_14, %c0_15] : memref<60x28xf32, #tpu.memory_space<vmem>>, vector<56x28xf32>
    %c0_16 = arith.constant 0 : index
    %c0_17 = arith.constant 0 : index
    %c0_18 = arith.constant 0 : index
    %11 = vector.load %arg1[%c0_16, %c0_17, %c0_18] : memref<5x28x168xf32, #tpu.memory_space<vmem>>, vector<1x28x168xf32>
    %12 = vector.shape_cast %11 : vector<1x28x168xf32> to vector<28x168xf32>
    %cst_19 = arith.constant dense<0.000000e+00> : vector<56x168xf32>
    %13 = tpu.matmul %10, %12, %cst_19 {dimension_numbers = #tpu.dot_dimension_numbers<[1], [0], [0], [1], [0, 0, 1, 1], [], []>} : vector<56x28xf32>, vector<28x168xf32>, vector<56x168xf32> -> vector<56x168xf32>
    %c1 = arith.constant 1 : index
    %c0_20 = arith.constant 0 : index
    %14 = vector.load %arg18[%c1, %c0_20] : memref<60x28xf32, #tpu.memory_space<vmem>>, vector<56x28xf32>
    %c1_21 = arith.constant 1 : index
    %c0_22 = arith.constant 0 : index
    %c0_23 = arith.constant 0 : index
    %15 = vector.load %arg1[%c1_21, %c0_22, %c0_23] : memref<5x28x168xf32, #tpu.memory_space<vmem>>, vector<1x28x168xf32>
    %16 = vector.shape_cast %15 : vector<1x28x168xf32> to vector<28x168xf32>
    %cst_24 = arith.constant dense<0.000000e+00> : vector<56x168xf32>
    %17 = tpu.matmul %14, %16, %cst_24 {dimension_numbers = #tpu.dot_dimension_numbers<[1], [0], [0], [1], [0, 0, 1, 1], [], []>} : vector<56x28xf32>, vector<28x168xf32>, vector<56x168xf32> -> vector<56x168xf32>
    %18 = arith.addf %13, %17 : vector<56x168xf32>
    %c2 = arith.constant 2 : index
    %c0_25 = arith.constant 0 : index
    %19 = vector.load %arg18[%c2, %c0_25] : memref<60x28xf32, #tpu.memory_space<vmem>>, vector<56x28xf32>
    %c2_26 = arith.constant 2 : index
    %c0_27 = arith.constant 0 : index
    %c0_28 = arith.constant 0 : index
    %20 = vector.load %arg1[%c2_26, %c0_27, %c0_28] : memref<5x28x168xf32, #tpu.memory_space<vmem>>, vector<1x28x168xf32>
    %21 = vector.shape_cast %20 : vector<1x28x168xf32> to vector<28x168xf32>
    %cst_29 = arith.constant dense<0.000000e+00> : vector<56x168xf32>
    %22 = tpu.matmul %19, %21, %cst_29 {dimension_numbers = #tpu.dot_dimension_numbers<[1], [0], [0], [1], [0, 0, 1, 1], [], []>} : vector<56x28xf32>, vector<28x168xf32>, vector<56x168xf32> -> vector<56x168xf32>
    %23 = arith.addf %18, %22 : vector<56x168xf32>
    %c3 = arith.constant 3 : index
    %c0_30 = arith.constant 0 : index
    %24 = vector.load %arg18[%c3, %c0_30] : memref<60x28xf32, #tpu.memory_space<vmem>>, vector<56x28xf32>
    %c3_31 = arith.constant 3 : index
    %c0_32 = arith.constant 0 : index
    %c0_33 = arith.constant 0 : index
    %25 = vector.load %arg1[%c3_31, %c0_32, %c0_33] : memref<5x28x168xf32, #tpu.memory_space<vmem>>, vector<1x28x168xf32>
    %26 = vector.shape_cast %25 : vector<1x28x168xf32> to vector<28x168xf32>
    %cst_34 = arith.constant dense<0.000000e+00> : vector<56x168xf32>
    %27 = tpu.matmul %24, %26, %cst_34 {dimension_numbers = #tpu.dot_dimension_numbers<[1], [0], [0], [1], [0, 0, 1, 1], [], []>} : vector<56x28xf32>, vector<28x168xf32>, vector<56x168xf32> -> vector<56x168xf32>
    %28 = arith.addf %23, %27 : vector<56x168xf32>
    %c4 = arith.constant 4 : index
    %c0_35 = arith.constant 0 : index
    %29 = vector.load %arg18[%c4, %c0_35] : memref<60x28xf32, #tpu.memory_space<vmem>>, vector<56x28xf32>
    %c4_36 = arith.constant 4 : index
    %c0_37 = arith.constant 0 : index
    %c0_38 = arith.constant 0 : index
    %30 = vector.load %arg1[%c4_36, %c0_37, %c0_38] : memref<5x28x168xf32, #tpu.memory_space<vmem>>, vector<1x28x168xf32>
    %31 = vector.shape_cast %30 : vector<1x28x168xf32> to vector<28x168xf32>
    %cst_39 = arith.constant dense<0.000000e+00> : vector<56x168xf32>
    %32 = tpu.matmul %29, %31, %cst_39 {dimension_numbers = #tpu.dot_dimension_numbers<[1], [0], [0], [1], [0, 0, 1, 1], [], []>} : vector<56x28xf32>, vector<28x168xf32>, vector<56x168xf32> -> vector<56x168xf32>
    %33 = arith.addf %28, %32 : vector<56x168xf32>
    %c0_40 = arith.constant 0 : index
    %c0_41 = arith.constant 0 : index
    %34 = vector.load %arg2[%c0_40, %c0_41] : memref<1x168xf32, #tpu.memory_space<vmem>>, vector<1x168xf32>
    %35 = vector.broadcast %34 : vector<1x168xf32> to vector<56x168xf32>
    %36 = arith.addf %33, %35 : vector<56x168xf32>
    %cst_42 = arith.constant 0.000000e+00 : f32
    %37 = vector.broadcast %cst_42 : f32 to vector<56x168xf32>
    %38 = arith.maximumf %36, %37 : vector<56x168xf32>
    %c0_43 = arith.constant 0 : index
    %c0_44 = arith.constant 0 : index
    %39 = vector.load %arg19[%c0_43, %c0_44] : memref<57x168xf32, #tpu.memory_space<vmem>>, vector<56x168xf32>
    tpu.vector_store %arg19[%c0_43, %c0_44], %38 {strides = array<i32>} : memref<57x168xf32, #tpu.memory_space<vmem>>, vector<56x168xf32>,
    %c0_45 = arith.constant 0 : index
    %c0_46 = arith.constant 0 : index
    %40 = vector.load %arg19[%c0_45, %c0_46] : memref<57x168xf32, #tpu.memory_space<vmem>>, vector<56x168xf32>
    %c1_47 = arith.constant 1 : index
    %c0_48 = arith.constant 0 : index
    %41 = vector.load %arg19[%c1_47, %c0_48] : memref<57x168xf32, #tpu.memory_space<vmem>>, vector<56x168xf32>
    %42 = arith.maximumf %40, %41 : vector<56x168xf32>
    %c0_49 = arith.constant 0 : index
    %c0_50 = arith.constant 0 : index
    %43 = vector.load %arg3[%c0_49, %c0_50] : memref<168x72xf32, #tpu.memory_space<vmem>>, vector<168x72xf32>
    %cst_51 = arith.constant dense<0.000000e+00> : vector<56x72xf32>
    %44 = tpu.matmul %42, %43, %cst_51 {dimension_numbers = #tpu.dot_dimension_numbers<[1], [0], [0], [1], [0, 0, 1, 1], [], []>} : vector<56x168xf32>, vector<168x72xf32>, vector<56x72xf32> -> vector<56x72xf32>
    %c0_52 = arith.constant 0 : index
    %c0_53 = arith.constant 0 : index
    %45 = vector.load %arg4[%c0_52, %c0_53] : memref<168x72xf32, #tpu.memory_space<vmem>>, vector<168x72xf32>
    %cst_54 = arith.constant dense<0.000000e+00> : vector<56x72xf32>
    %46 = tpu.matmul %42, %45, %cst_54 {dimension_numbers = #tpu.dot_dimension_numbers<[1], [0], [0], [1], [0, 0, 1, 1], [], []>} : vector<56x168xf32>, vector<168x72xf32>, vector<56x72xf32> -> vector<56x72xf32>
    %47 = arith.maximumf %44, %46 : vector<56x72xf32>
    %c0_55 = arith.constant 0 : index
    %c0_56 = arith.constant 0 : index
    %48 = vector.load %arg5[%c0_55, %c0_56] : memref<24x56xf32, #tpu.memory_space<vmem>>, vector<24x56xf32>
    %cst_57 = arith.constant dense<0.000000e+00> : vector<24x72xf32>
    %49 = tpu.matmul %48, %47, %cst_57 {dimension_numbers = #tpu.dot_dimension_numbers<[1], [0], [0], [1], [0, 0, 1, 1], [], []>} : vector<24x56xf32>, vector<56x72xf32>, vector<24x72xf32> -> vector<24x72xf32>
    %c0_58 = arith.constant 0 : index
    %c0_59 = arith.constant 0 : index
    %50 = vector.load %arg20[%c0_58, %c0_59] : memref<28x72xf32, #tpu.memory_space<vmem>>, vector<24x72xf32>
    tpu.vector_store %arg20[%c0_58, %c0_59], %49 {strides = array<i32>} : memref<28x72xf32, #tpu.memory_space<vmem>>, vector<24x72xf32>,
    %c0_60 = arith.constant 0 : index
    %c0_61 = arith.constant 0 : index
    %51 = vector.load %arg20[%c0_60, %c0_61] : memref<28x72xf32, #tpu.memory_space<vmem>>, vector<24x72xf32>
    %c0_62 = arith.constant 0 : index
    %c0_63 = arith.constant 0 : index
    %c0_64 = arith.constant 0 : index
    %52 = vector.load %arg6[%c0_62, %c0_63, %c0_64] : memref<5x72x192xf32, #tpu.memory_space<vmem>>, vector<1x72x192xf32>
    %53 = vector.shape_cast %52 : vector<1x72x192xf32> to vector<72x192xf32>
    %cst_65 = arith.constant dense<0.000000e+00> : vector<24x192xf32>
    %54 = tpu.matmul %51, %53, %cst_65 {dimension_numbers = #tpu.dot_dimension_numbers<[1], [0], [0], [1], [0, 0, 1, 1], [], []>} : vector<24x72xf32>, vector<72x192xf32>, vector<24x192xf32> -> vector<24x192xf32>
    %c1_66 = arith.constant 1 : index
    %c0_67 = arith.constant 0 : index
    %55 = vector.load %arg20[%c1_66, %c0_67] : memref<28x72xf32, #tpu.memory_space<vmem>>, vector<24x72xf32>
    %c1_68 = arith.constant 1 : index
    %c0_69 = arith.constant 0 : index
    %c0_70 = arith.constant 0 : index
    %56 = vector.load %arg6[%c1_68, %c0_69, %c0_70] : memref<5x72x192xf32, #tpu.memory_space<vmem>>, vector<1x72x192xf32>
    %57 = vector.shape_cast %56 : vector<1x72x192xf32> to vector<72x192xf32>
    %cst_71 = arith.constant dense<0.000000e+00> : vector<24x192xf32>
    %58 = tpu.matmul %55, %57, %cst_71 {dimension_numbers = #tpu.dot_dimension_numbers<[1], [0], [0], [1], [0, 0, 1, 1], [], []>} : vector<24x72xf32>, vector<72x192xf32>, vector<24x192xf32> -> vector<24x192xf32>
    %59 = arith.addf %54, %58 : vector<24x192xf32>
    %c2_72 = arith.constant 2 : index
    %c0_73 = arith.constant 0 : index
    %60 = vector.load %arg20[%c2_72, %c0_73] : memref<28x72xf32, #tpu.memory_space<vmem>>, vector<24x72xf32>
    %c2_74 = arith.constant 2 : index
    %c0_75 = arith.constant 0 : index
    %c0_76 = arith.constant 0 : index
    %61 = vector.load %arg6[%c2_74, %c0_75, %c0_76] : memref<5x72x192xf32, #tpu.memory_space<vmem>>, vector<1x72x192xf32>
    %62 = vector.shape_cast %61 : vector<1x72x192xf32> to vector<72x192xf32>
    %cst_77 = arith.constant dense<0.000000e+00> : vector<24x192xf32>
    %63 = tpu.matmul %60, %62, %cst_77 {dimension_numbers = #tpu.dot_dimension_numbers<[1], [0], [0], [1], [0, 0, 1, 1], [], []>} : vector<24x72xf32>, vector<72x192xf32>, vector<24x192xf32> -> vector<24x192xf32>
    %64 = arith.addf %59, %63 : vector<24x192xf32>
    %c3_78 = arith.constant 3 : index
    %c0_79 = arith.constant 0 : index
    %65 = vector.load %arg20[%c3_78, %c0_79] : memref<28x72xf32, #tpu.memory_space<vmem>>, vector<24x72xf32>
    %c3_80 = arith.constant 3 : index
    %c0_81 = arith.constant 0 : index
    %c0_82 = arith.constant 0 : index
    %66 = vector.load %arg6[%c3_80, %c0_81, %c0_82] : memref<5x72x192xf32, #tpu.memory_space<vmem>>, vector<1x72x192xf32>
    %67 = vector.shape_cast %66 : vector<1x72x192xf32> to vector<72x192xf32>
    %cst_83 = arith.constant dense<0.000000e+00> : vector<24x192xf32>
    %68 = tpu.matmul %65, %67, %cst_83 {dimension_numbers = #tpu.dot_dimension_numbers<[1], [0], [0], [1], [0, 0, 1, 1], [], []>} : vector<24x72xf32>, vector<72x192xf32>, vector<24x192xf32> -> vector<24x192xf32>
    %69 = arith.addf %64, %68 : vector<24x192xf32>
    %c4_84 = arith.constant 4 : index
    %c0_85 = arith.constant 0 : index
    %70 = vector.load %arg20[%c4_84, %c0_85] : memref<28x72xf32, #tpu.memory_space<vmem>>, vector<24x72xf32>
    %c4_86 = arith.constant 4 : index
    %c0_87 = arith.constant 0 : index
    %c0_88 = arith.constant 0 : index
    %71 = vector.load %arg6[%c4_86, %c0_87, %c0_88] : memref<5x72x192xf32, #tpu.memory_space<vmem>>, vector<1x72x192xf32>
    %72 = vector.shape_cast %71 : vector<1x72x192xf32> to vector<72x192xf32>
    %cst_89 = arith.constant dense<0.000000e+00> : vector<24x192xf32>
    %73 = tpu.matmul %70, %72, %cst_89 {dimension_numbers = #tpu.dot_dimension_numbers<[1], [0], [0], [1], [0, 0, 1, 1], [], []>} : vector<24x72xf32>, vector<72x192xf32>, vector<24x192xf32> -> vector<24x192xf32>
    %74 = arith.addf %69, %73 : vector<24x192xf32>
    %c0_90 = arith.constant 0 : index
    %c0_91 = arith.constant 0 : index
    %75 = vector.load %arg7[%c0_90, %c0_91] : memref<1x192xf32, #tpu.memory_space<vmem>>, vector<1x192xf32>
    %76 = vector.broadcast %75 : vector<1x192xf32> to vector<24x192xf32>
    %77 = arith.addf %74, %76 : vector<24x192xf32>
    %cst_92 = arith.constant 0.000000e+00 : f32
    %78 = vector.broadcast %cst_92 : f32 to vector<24x192xf32>
    %79 = arith.maximumf %77, %78 : vector<24x192xf32>
    %c0_93 = arith.constant 0 : index
    %c0_94 = arith.constant 0 : index
    %80 = vector.load %arg21[%c0_93, %c0_94] : memref<25x192xf32, #tpu.memory_space<vmem>>, vector<24x192xf32>
    tpu.vector_store %arg21[%c0_93, %c0_94], %79 {strides = array<i32>} : memref<25x192xf32, #tpu.memory_space<vmem>>, vector<24x192xf32>,
    %c0_95 = arith.constant 0 : index
    %c0_96 = arith.constant 0 : index
    %81 = vector.load %arg21[%c0_95, %c0_96] : memref<25x192xf32, #tpu.memory_space<vmem>>, vector<24x192xf32>
    %c1_97 = arith.constant 1 : index
    %c0_98 = arith.constant 0 : index
    %82 = vector.load %arg21[%c1_97, %c0_98] : memref<25x192xf32, #tpu.memory_space<vmem>>, vector<24x192xf32>
    %83 = arith.maximumf %81, %82 : vector<24x192xf32>
    %c0_99 = arith.constant 0 : index
    %c0_100 = arith.constant 0 : index
    %84 = vector.load %arg8[%c0_99, %c0_100] : memref<192x64xf32, #tpu.memory_space<vmem>>, vector<192x64xf32>
    %cst_101 = arith.constant dense<0.000000e+00> : vector<24x64xf32>
    %85 = tpu.matmul %83, %84, %cst_101 {dimension_numbers = #tpu.dot_dimension_numbers<[1], [0], [0], [1], [0, 0, 1, 1], [], []>} : vector<24x192xf32>, vector<192x64xf32>, vector<24x64xf32> -> vector<24x64xf32>
    %c0_102 = arith.constant 0 : index
    %c0_103 = arith.constant 0 : index
    %86 = vector.load %arg9[%c0_102, %c0_103] : memref<192x64xf32, #tpu.memory_space<vmem>>, vector<192x64xf32>
    %cst_104 = arith.constant dense<0.000000e+00> : vector<24x64xf32>
    %87 = tpu.matmul %83, %86, %cst_104 {dimension_numbers = #tpu.dot_dimension_numbers<[1], [0], [0], [1], [0, 0, 1, 1], [], []>} : vector<24x192xf32>, vector<192x64xf32>, vector<24x64xf32> -> vector<24x64xf32>
    %88 = arith.maximumf %85, %87 : vector<24x64xf32>
    %c0_105 = arith.constant 0 : index
    %c0_106 = arith.constant 0 : index
    %c0_107 = arith.constant 0 : index
    %89 = vector.load %arg10[%c0_105, %c0_106, %c0_107] : memref<4x2x24xf32, #tpu.memory_space<vmem>>, vector<1x2x24xf32>
    %90 = vector.shape_cast %89 : vector<1x2x24xf32> to vector<2x24xf32>
    %cst_108 = arith.constant dense<0.000000e+00> : vector<2x64xf32>
    %91 = tpu.matmul %90, %88, %cst_108 {dimension_numbers = #tpu.dot_dimension_numbers<[1], [0], [0], [1], [0, 0, 1, 1], [], []>} : vector<2x24xf32>, vector<24x64xf32>, vector<2x64xf32> -> vector<2x64xf32>
    %c0_109 = arith.constant 0 : index
    %c0_110 = arith.constant 0 : index
    %c0_111 = arith.constant 0 : index
    %92 = vector.load %arg11[%c0_109, %c0_110, %c0_111] : memref<4x64x120xf32, #tpu.memory_space<vmem>>, vector<1x64x120xf32>
    %93 = vector.shape_cast %92 : vector<1x64x120xf32> to vector<64x120xf32>
    %cst_112 = arith.constant dense<0.000000e+00> : vector<2x120xf32>
    %94 = tpu.matmul %91, %93, %cst_112 {dimension_numbers = #tpu.dot_dimension_numbers<[1], [0], [0], [1], [0, 0, 1, 1], [], []>} : vector<2x64xf32>, vector<64x120xf32>, vector<2x120xf32> -> vector<2x120xf32>
    %c1_113 = arith.constant 1 : index
    %c0_114 = arith.constant 0 : index
    %c0_115 = arith.constant 0 : index
    %95 = vector.load %arg10[%c1_113, %c0_114, %c0_115] : memref<4x2x24xf32, #tpu.memory_space<vmem>>, vector<1x2x24xf32>
    %96 = vector.shape_cast %95 : vector<1x2x24xf32> to vector<2x24xf32>
    %cst_116 = arith.constant dense<0.000000e+00> : vector<2x64xf32>
    %97 = tpu.matmul %96, %88, %cst_116 {dimension_numbers = #tpu.dot_dimension_numbers<[1], [0], [0], [1], [0, 0, 1, 1], [], []>} : vector<2x24xf32>, vector<24x64xf32>, vector<2x64xf32> -> vector<2x64xf32>
    %c1_117 = arith.constant 1 : index
    %c0_118 = arith.constant 0 : index
    %c0_119 = arith.constant 0 : index
    %98 = vector.load %arg11[%c1_117, %c0_118, %c0_119] : memref<4x64x120xf32, #tpu.memory_space<vmem>>, vector<1x64x120xf32>
    %99 = vector.shape_cast %98 : vector<1x64x120xf32> to vector<64x120xf32>
    %cst_120 = arith.constant dense<0.000000e+00> : vector<2x120xf32>
    %100 = tpu.matmul %97, %99, %cst_120 {dimension_numbers = #tpu.dot_dimension_numbers<[1], [0], [0], [1], [0, 0, 1, 1], [], []>} : vector<2x64xf32>, vector<64x120xf32>, vector<2x120xf32> -> vector<2x120xf32>
    %101 = arith.addf %94, %100 : vector<2x120xf32>
    %c2_121 = arith.constant 2 : index
    %c0_122 = arith.constant 0 : index
    %c0_123 = arith.constant 0 : index
    %102 = vector.load %arg10[%c2_121, %c0_122, %c0_123] : memref<4x2x24xf32, #tpu.memory_space<vmem>>, vector<1x2x24xf32>
    %103 = vector.shape_cast %102 : vector<1x2x24xf32> to vector<2x24xf32>
    %cst_124 = arith.constant dense<0.000000e+00> : vector<2x64xf32>
    %104 = tpu.matmul %103, %88, %cst_124 {dimension_numbers = #tpu.dot_dimension_numbers<[1], [0], [0], [1], [0, 0, 1, 1], [], []>} : vector<2x24xf32>, vector<24x64xf32>, vector<2x64xf32> -> vector<2x64xf32>
    %c2_125 = arith.constant 2 : index
    %c0_126 = arith.constant 0 : index
    %c0_127 = arith.constant 0 : index
    %105 = vector.load %arg11[%c2_125, %c0_126, %c0_127] : memref<4x64x120xf32, #tpu.memory_space<vmem>>, vector<1x64x120xf32>
    %106 = vector.shape_cast %105 : vector<1x64x120xf32> to vector<64x120xf32>
    %cst_128 = arith.constant dense<0.000000e+00> : vector<2x120xf32>
    %107 = tpu.matmul %104, %106, %cst_128 {dimension_numbers = #tpu.dot_dimension_numbers<[1], [0], [0], [1], [0, 0, 1, 1], [], []>} : vector<2x64xf32>, vector<64x120xf32>, vector<2x120xf32> -> vector<2x120xf32>
    %108 = arith.addf %101, %107 : vector<2x120xf32>
    %c3_129 = arith.constant 3 : index
    %c0_130 = arith.constant 0 : index
    %c0_131 = arith.constant 0 : index
    %109 = vector.load %arg10[%c3_129, %c0_130, %c0_131] : memref<4x2x24xf32, #tpu.memory_space<vmem>>, vector<1x2x24xf32>
    %110 = vector.shape_cast %109 : vector<1x2x24xf32> to vector<2x24xf32>
    %cst_132 = arith.constant dense<0.000000e+00> : vector<2x64xf32>
    %111 = tpu.matmul %110, %88, %cst_132 {dimension_numbers = #tpu.dot_dimension_numbers<[1], [0], [0], [1], [0, 0, 1, 1], [], []>} : vector<2x24xf32>, vector<24x64xf32>, vector<2x64xf32> -> vector<2x64xf32>
    %c3_133 = arith.constant 3 : index
    %c0_134 = arith.constant 0 : index
    %c0_135 = arith.constant 0 : index
    %112 = vector.load %arg11[%c3_133, %c0_134, %c0_135] : memref<4x64x120xf32, #tpu.memory_space<vmem>>, vector<1x64x120xf32>
    %113 = vector.shape_cast %112 : vector<1x64x120xf32> to vector<64x120xf32>
    %cst_136 = arith.constant dense<0.000000e+00> : vector<2x120xf32>
    %114 = tpu.matmul %111, %113, %cst_136 {dimension_numbers = #tpu.dot_dimension_numbers<[1], [0], [0], [1], [0, 0, 1, 1], [], []>} : vector<2x64xf32>, vector<64x120xf32>, vector<2x120xf32> -> vector<2x120xf32>
    %115 = arith.addf %108, %114 : vector<2x120xf32>
    %c0_137 = arith.constant 0 : index
    %c0_138 = arith.constant 0 : index
    %116 = vector.load %arg12[%c0_137, %c0_138] : memref<1x120xf32, #tpu.memory_space<vmem>>, vector<1x120xf32>
    %117 = vector.broadcast %116 : vector<1x120xf32> to vector<2x120xf32>
    %118 = arith.addf %115, %117 : vector<2x120xf32>
    %cst_139 = arith.constant 0.000000e+00 : f32
    %119 = vector.broadcast %cst_139 : f32 to vector<2x120xf32>
    %120 = arith.maximumf %118, %119 : vector<2x120xf32>
    %c0_140 = arith.constant 0 : index
    %c0_141 = arith.constant 0 : index
    %121 = vector.load %arg13[%c0_140, %c0_141] : memref<120x84xf32, #tpu.memory_space<vmem>>, vector<120x84xf32>
    %cst_142 = arith.constant dense<0.000000e+00> : vector<2x84xf32>
    %122 = tpu.matmul %120, %121, %cst_142 {dimension_numbers = #tpu.dot_dimension_numbers<[1], [0], [0], [1], [0, 0, 1, 1], [], []>} : vector<2x120xf32>, vector<120x84xf32>, vector<2x84xf32> -> vector<2x84xf32>
    %c0_143 = arith.constant 0 : index
    %c0_144 = arith.constant 0 : index
    %123 = vector.load %arg14[%c0_143, %c0_144] : memref<1x84xf32, #tpu.memory_space<vmem>>, vector<1x84xf32>
    %124 = vector.broadcast %123 : vector<1x84xf32> to vector<2x84xf32>
    %125 = arith.addf %122, %124 : vector<2x84xf32>
    %cst_145 = arith.constant 0.000000e+00 : f32
    %126 = vector.broadcast %cst_145 : f32 to vector<2x84xf32>
    %127 = arith.maximumf %125, %126 : vector<2x84xf32>
    %c0_146 = arith.constant 0 : index
    %c0_147 = arith.constant 0 : index
    %128 = vector.load %arg15[%c0_146, %c0_147] : memref<84x128xf32, #tpu.memory_space<vmem>>, vector<84x128xf32>
    %cst_148 = arith.constant dense<0.000000e+00> : vector<2x128xf32>
    %129 = tpu.matmul %127, %128, %cst_148 {dimension_numbers = #tpu.dot_dimension_numbers<[1], [0], [0], [1], [0, 0, 1, 1], [], []>} : vector<2x84xf32>, vector<84x128xf32>, vector<2x128xf32> -> vector<2x128xf32>
    %c0_149 = arith.constant 0 : index
    %c0_150 = arith.constant 0 : index
    %130 = vector.load %arg16[%c0_149, %c0_150] : memref<1x128xf32, #tpu.memory_space<vmem>>, vector<1x128xf32>
    %131 = vector.broadcast %130 : vector<1x128xf32> to vector<2x128xf32>
    %132 = arith.addf %129, %131 : vector<2x128xf32>
    %c0_151 = arith.constant 0 : index
    %c0_152 = arith.constant 0 : index
    %133 = vector.load %arg17[%c0_151, %c0_152] : memref<2x128xf32, #tpu.memory_space<vmem>>, vector<2x128xf32>
    tpu.vector_store %arg17[%c0_151, %c0_152], %132 {strides = array<i32>} : memref<2x128xf32, #tpu.memory_space<vmem>>, vector<2x128xf32>,
    return
  }
}

</mosaic_0001>

<bundles_post_ra>
// kernel: net_forward.1
= control target key start
LH: loop header
LB: loop body
LE: loop exit
PB: predicated region body
PF: predicated region fallthrough
CT: control target
= control target key end

     0   :  { %s5956_s0 = inlined_call_operand.hbm [shape: f32[56,28], index: 0, kind: input, shape index: {}]   ;;  %s5957_s1 = inlined_call_operand.vmem [shape: f32[5,28,168], index: 1, kind: input, shape index: {}]   ;;  %s5958_s2 = inlined_call_operand.hbm [shape: f32[1,168], index: 2, kind: input, shape index: {}]   ;;  %s5959_s3 = inlined_call_operand.vmem [shape: f32[168,72], index: 3, kind: input, shape index: {}]   ;;  %s5960_s4 = inlined_call_operand.vmem [shape: f32[168,72], index: 4, kind: input, shape index: {}]   ;;  %s5961_s5 = inlined_call_operand.hbm [shape: f32[24,56], index: 5, kind: input, shape index: {}]   ;;  %s5962_s6 = inlined_call_operand.vmem [shape: f32[5,72,192], index: 6, kind: input, shape index: {}]   ;;  %s5963_s7 = inlined_call_operand.hbm [shape: f32[1,192], index: 7, kind: input, shape index: {}]   ;;  %s5964_s8 = inlined_call_operand.vmem [shape: f32[192,64], index: 8, kind: input, shape index: {}]   ;;  %s5965_s9 = inlined_call_operand.vmem [shape: f32[192,64], index: 9, kind: input, shape index: {}]   ;;  %s5966_s10 = inlined_call_operand.hbm [shape: f32[4,2,24], index: 10, kind: input, shape index: {}]   ;;  %s5967_s11 = inlined_call_operand.vmem [shape: f32[4,64,120], index: 11, kind: input, shape index: {}]   ;;  %s5968_s12 = inlined_call_operand.hbm [shape: f32[1,120], index: 12, kind: input, shape index: {}]   ;;  %s5969_s13 = inlined_call_operand.vmem [shape: f32[120,84], index: 13, kind: input, shape index: {}]   ;;  %s5970_s14 = inlined_call_operand.hbm [shape: f32[1,84], index: 14, kind: input, shape index: {}]   ;;  %s5971_s15 = inlined_call_operand.vmem [shape: f32[84,128], index: 15, kind: input, shape index: {}]   ;;  %s5972_s16 = inlined_call_operand.hbm [shape: f32[1,128], index: 16, kind: input, shape index: {}]   ;;  %s5973_s17 = inlined_call_operand.hbm [shape: f32[2,128], index: 17, kind: output, shape index: {}]  }
   0x1   :  { %5976 = sst [smem:[#allocation27_spill]] %s5956_s0 }
   0x2   :  { %5977 = sst [smem:[#allocation28_spill]] %s5957_s1 }
   0x3   :  { %22 = vsyncpa [#allocation7], 0 }
   0x4   :  { %23 = vsyncpa [#allocation10], 0 }
   0x5   :  { %24 = vsyncpa [#allocation13], 0 }
   0x6   :  { %25 = vsyncpa [#allocation16], 0 }
   0x7   :  { %26 = vsyncpa [#allocation19], 0 }
   0x8   :  { %27 = vsyncpa [#allocation8], 0  ;;  %s4432_s24 = smov [#allocation9]   ;;  %s4433_s26 = smov [#allocation12]  }
   0x9   :  { %s48_s25 = sshll.u32 %s4432_s24, 4  ;;  %s76_s27 = sshll.u32 %s4433_s26, 4  ;;  %s49_s25 = int_to_ptr.vmem [resolvable:$true] %s48_s25  ;;  %s77_s27 = int_to_ptr.vmem [resolvable:$true] %s76_s27 }
   0xa   :  { %s4222_s0 = scalar_lea.hbm %s5958_s2, 32 }
   0xb   :  { %p4223_p0 = scmp.ne.s32.totalorder %s5958_s2, %s4222_s0  ;;  %p4226_p1 = scmp.lt.u32.totalorder %s4222_s0, %s5958_s2 }
   0xd   :  { %p4228_p2 = pnand %p4226_p1, %p4223_p0 }
   0xf   :  { %4231 = shalt.err (!%p4228_p2)
}
  0x10   :  { %s4232_s20 = scalar_lea.vmem %s49_s25, 32  ;;  %p4237_p4 = scmp.lt.s32.totalorder %s49_s25, %s49_s25 }
  0x11   :  { %p4233_p3 = scmp.ne.s32.totalorder %s49_s25, %s4232_s20  ;;  %p4238_p5 = scmp.lt.s32.totalorder %s4232_s20, %s4232_s20 }
  0x13   :  { %p4239_p6 = por %p4238_p5, %p4237_p4 }
  0x15   :  { %p4240_p7 = pnand %p4239_p6, %p4233_p3 }
  0x17   :  { %4243 = shalt.err (!%p4240_p7)
}
  0x18   :  { %51 = dma.hbm_to_vmem [thread:$0]  %s5958_s2, 32, %s49_s25, [#allocation10]  }
  0x19   :  { %s4244_s26 = scalar_lea.hbm %s5963_s7, 32 }
  0x1a   :  { %p4245_p8 = scmp.ne.s32.totalorder %s5963_s7, %s4244_s26  ;;  %p4248_p9 = scmp.lt.u32.totalorder %s4244_s26, %s5963_s7 }
  0x1c   :  { %p4250_p10 = pnand %p4248_p9, %p4245_p8 }
  0x1e   :  { %4253 = shalt.err (!%p4250_p10)
}
  0x1f   :  { %s4254_s18 = scalar_lea.vmem %s77_s27, 32  ;;  %p4259_p12 = scmp.lt.s32.totalorder %s77_s27, %s77_s27 }
  0x20   :  { %p4255_p11 = scmp.ne.s32.totalorder %s77_s27, %s4254_s18  ;;  %p4260_p13 = scmp.lt.s32.totalorder %s4254_s18, %s4254_s18 }
  0x22   :  { %p4261_p0 = por %p4260_p13, %p4259_p12 }
  0x24   :  { %p4262_p1 = pnand %p4261_p0, %p4255_p11 }
  0x26   :  { %4265 = shalt.err (!%p4262_p1)
}
  0x27   :  { %79 = dma.hbm_to_vmem [thread:$0]  %s5963_s7, 32, %s77_s27, [#allocation13]  }
  0x28   :  { %s4434_s19 = smov [#allocation15]   ;;  %s4435_s20 = smov [#allocation6]  }
  0x29   :  { %s104_s1 = sshll.u32 %s4434_s19, 4  ;;  %s33_s21 = sshll.u32 %s4435_s20, 4  ;;  %s105_s1 = int_to_ptr.vmem [resolvable:$true] %s104_s1  ;;  %s4563_s21 = int_to_ptr.vmem [resolvable:$true] %s33_s21 }
  0x2a   :  { %s4266_s24 = scalar_lea.hbm %s5968_s12, 16 }
  0x2b   :  { %p4267_p2 = scmp.ne.s32.totalorder %s5968_s12, %s4266_s24  ;;  %p4270_p3 = scmp.lt.u32.totalorder %s4266_s24, %s5968_s12 }
  0x2d   :  { %p4272_p4 = pnand %p4270_p3, %p4267_p2 }
  0x2f   :  { %4275 = shalt.err (!%p4272_p4)
}
  0x30   :  { %s4276_s7 = scalar_lea.vmem %s105_s1, 16  ;;  %s4280_s27 = scalar_lea.vmem %s105_s1, 32 }
  0x31   :  { %p4277_p5 = scmp.ne.s32.totalorder %s105_s1, %s4276_s7  ;;  %p4281_p6 = scmp.lt.s32.totalorder %s105_s1, %s105_s1 }
  0x32   :  { %p4282_p7 = scmp.lt.s32.totalorder %s4280_s27, %s4276_s7 }
  0x34   :  { %p4283_p8 = por %p4282_p7, %p4281_p6 }
  0x36   :  { %p4284_p9 = pnand %p4283_p8, %p4277_p5 }
  0x38   :  { %4287 = shalt.err (!%p4284_p9)
}
  0x39   :  { %107 = dma.hbm_to_vmem [thread:$0]  %s5968_s12, 16, %s105_s1, [#allocation16]  }
  0x3a   :  { %s5978_s19 = sld [smem:[#allocation27_spill]] }
  0x40   :  { %s4288_s20 = scalar_lea.hbm %s5978_s19, 896 }
  0x41   :  { %p4289_p10 = scmp.ne.s32.totalorder %s5978_s19, %s4288_s20  ;;  %p4292_p11 = scmp.lt.u32.totalorder %s4288_s20, %s5978_s19 }
  0x43   :  { %p4294_p12 = pnand %p4292_p11, %p4289_p10 }
  0x45   :  { %4297 = shalt.err (!%p4294_p12)
}
  0x46   :  { %s4298_s28 = scalar_lea.vmem %s4563_s21, 896  ;;  %p4303_p0 = scmp.lt.s32.totalorder %s4563_s21, %s4563_s21 }
  0x47   :  { %p4299_p13 = scmp.ne.s32.totalorder %s4563_s21, %s4298_s28  ;;  %p4304_p1 = scmp.lt.s32.totalorder %s4298_s28, %s4298_s28 }
  0x49   :  { %p4305_p2 = por %p4304_p1, %p4303_p0 }
  0x4b   :  { %p4306_p3 = pnand %p4305_p2, %p4299_p13 }
  0x4d   :  { %4309 = shalt.err (!%p4306_p3)
}
  0x4e   :  { %s4436_s12 = smov 128   ;;  %s4437_s1 = smov 8  }
  0x4f   :  { %39 = dma.hbm_to_vmem [thread:$0]  %s5978_s19, 896, %s4563_s21, [#allocation7], %s4436_s12, %s4436_s12, %s4437_s1  }
  0x50   :  { %s4438_s7 = smov [#allocation11]   ;;  %s4439_s30 = smov [#allocation14]  }
  0x51   :  { %s61_s27 = sshll.u32 %s4438_s7, 4  ;;  %s89_s18 = sshll.u32 %s4439_s30, 4  ;;  %s62_s27 = int_to_ptr.vmem [resolvable:$true] %s61_s27  ;;  %s4594_s18 = int_to_ptr.vmem [resolvable:$true] %s89_s18 }
  0x52   :  { %s4310_s20 = scalar_lea.hbm %s5961_s5, 384 }
  0x53   :  { %p4311_p4 = scmp.ne.s32.totalorder %s5961_s5, %s4310_s20  ;;  %p4314_p5 = scmp.lt.u32.totalorder %s4310_s20, %s5961_s5 }
  0x55   :  { %p4316_p6 = pnand %p4314_p5, %p4311_p4 }
  0x57   :  { %4319 = shalt.err (!%p4316_p6)
}
  0x58   :  { %s4320_s21 = scalar_lea.vmem %s62_s27, 384  ;;  %p4325_p8 = scmp.lt.s32.totalorder %s62_s27, %s62_s27 }
  0x59   :  { %p4321_p7 = scmp.ne.s32.totalorder %s62_s27, %s4320_s21  ;;  %p4326_p9 = scmp.lt.s32.totalorder %s4320_s21, %s4320_s21 }
  0x5b   :  { %p4327_p10 = por %p4326_p9, %p4325_p8 }
  0x5d   :  { %p4328_p11 = pnand %p4327_p10, %p4321_p7 }
  0x5f   :  { %4331 = shalt.err (!%p4328_p11)
}
  0x60   :  { %67 = dma.hbm_to_vmem [thread:$0]  %s5961_s5, 384, %s62_s27, [#allocation10], %s4436_s12, %s4436_s12, %s4437_s1  }
  0x61   :  { %s4332_s7 = scalar_lea.hbm %s5966_s10, 128 }
  0x62   :  { %p4333_p12 = scmp.ne.s32.totalorder %s5966_s10, %s4332_s7  ;;  %p4336_p13 = scmp.lt.u32.totalorder %s4332_s7, %s5966_s10 }
  0x64   :  { %p4338_p0 = pnand %p4336_p13, %p4333_p12 }
  0x66   :  { %4341 = shalt.err (!%p4338_p0)
}
  0x67   :  { %s4342_s22 = scalar_lea.vmem %s4594_s18, 128  ;;  %p4347_p2 = scmp.lt.s32.totalorder %s4594_s18, %s4594_s18 }
  0x68   :  { %p4343_p1 = scmp.ne.s32.totalorder %s4594_s18, %s4342_s22  ;;  %p4348_p3 = scmp.lt.s32.totalorder %s4342_s22, %s4342_s22 }
  0x6a   :  { %p4349_p4 = por %p4348_p3, %p4347_p2 }
  0x6c   :  { %p4350_p5 = pnand %p4349_p4, %p4343_p1 }
  0x6e   :  { %4353 = shalt.err (!%p4350_p5)
}
  0x6f   :  { %s4440_s5 = smov 32   ;;  %s4441_s12 = smov 2  }
  0x70   :  { %95 = dma.hbm_to_vmem [thread:$0]  %s5966_s10, 128, %s4594_s18, [#allocation13], %s4440_s5, %s4440_s5, %s4441_s12  }
  0x71   :  { %s4442_s23 = smov [#allocation17]   ;;  %s4443_s26 = smov [#allocation18]  }
  0x72   :  { %s116_s24 = sshll.u32 %s4442_s23, 4  ;;  %s128_s21 = sshll.u32 %s4443_s26, 4  ;;  %s117_s24 = int_to_ptr.vmem [resolvable:$true] %s116_s24  ;;  %s129_s21 = int_to_ptr.vmem [resolvable:$true] %s128_s21 }
  0x73   :  { %s4354_s29 = scalar_lea.hbm %s5970_s14, 16 }
  0x74   :  { %p4355_p6 = scmp.ne.s32.totalorder %s5970_s14, %s4354_s29  ;;  %p4358_p7 = scmp.lt.u32.totalorder %s4354_s29, %s5970_s14 }
  0x76   :  { %p4360_p8 = pnand %p4358_p7, %p4355_p6 }
  0x78   :  { %4363 = shalt.err (!%p4360_p8)
}
  0x79   :  { %s4364_s10 = scalar_lea.vmem %s117_s24, 16  ;;  %s4368_s18 = scalar_lea.vmem %s117_s24, 32 }
  0x7a   :  { %p4365_p9 = scmp.ne.s32.totalorder %s117_s24, %s4364_s10  ;;  %p4369_p10 = scmp.lt.s32.totalorder %s117_s24, %s117_s24 }
  0x7b   :  { %p4370_p11 = scmp.lt.s32.totalorder %s4368_s18, %s4364_s10 }
  0x7d   :  { %p4371_p12 = por %p4370_p11, %p4369_p10 }
  0x7f   :  { %p4372_p13 = pnand %p4371_p12, %p4365_p9 }
  0x81   :  { %4375 = shalt.err (!%p4372_p13)
}
  0x82   :  { %119 = dma.hbm_to_vmem [thread:$0]  %s5970_s14, 16, %s117_s24, [#allocation16]  }
  0x83   :  { %s4376_s12 = scalar_lea.hbm %s5972_s16, 16 }
  0x84   :  { %p4377_p0 = scmp.ne.s32.totalorder %s5972_s16, %s4376_s12  ;;  %p4380_p1 = scmp.lt.u32.totalorder %s4376_s12, %s5972_s16 }
  0x86   :  { %p4382_p2 = pnand %p4380_p1, %p4377_p0 }
  0x88   :  { %4385 = shalt.err (!%p4382_p2)
}
  0x89   :  { %s4386_s19 = scalar_lea.vmem %s129_s21, 16  ;;  %s4390_s28 = scalar_lea.vmem %s129_s21, 32 }
  0x8a   :  { %p4387_p3 = scmp.ne.s32.totalorder %s129_s21, %s4386_s19  ;;  %p4391_p4 = scmp.lt.s32.totalorder %s129_s21, %s129_s21 }
  0x8b   :  { %p4392_p5 = scmp.lt.s32.totalorder %s4390_s28, %s4386_s19 }
  0x8d   :  { %p4393_p6 = por %p4392_p5, %p4391_p4 }
  0x8f   :  { %p4394_p7 = pnand %p4393_p6, %p4387_p3 }
  0x91   :  { %4397 = shalt.err (!%p4394_p7)
}
  0x92   :  { %131 = dma.hbm_to_vmem [thread:$0]  %s5972_s16, 16, %s129_s21, [#allocation19]  }
  0x93   :  { %4420 = dma.done.wait [#allocation7], 896  }
  0x94   :  { %4421 = vsyncadd [#allocation7], 4294966400 }
  0x95   :  { %4422 = dma.done.wait [#allocation10], 416  }
  0x96   :  { %4423 = vsyncadd [#allocation10], 4294966880 }
  0x97   :  { %4424 = dma.done.wait [#allocation13], 160  }
  0x98   :  { %4425 = vsyncadd [#allocation13], 4294967136 }
  0x99   :  { %4426 = dma.done.wait [#allocation16], 32  }
  0x9a   :  { %4427 = vsyncadd [#allocation16], 4294967264 }
  0x9b   :  { %4428 = dma.done.wait [#allocation19], 16  }
  0x9c   :  { %4429 = vsyncadd [#allocation19], 4294967280  ;;  %vm156_vm0 = vcmask 228352   ;;  %v4444_v0 = vmov 0.0   ;;  %vm164_vm1 = vcmask 224256   ;;  %vm266_vm2 = vcmask 1043456  }
  0x9d   :  { %337 = vmatprep.mubr.f32.mxu0 %v4444_v0  ;;  %181 = vst [vmem:[#allocation3 + $0x70] sm:$0x1] %v4444_v0  ;;  %197 = vst [vmem:[#allocation5 + $0x30] sm:$0x1] %v4444_v0  ;;  %vm4445_vm3 = vmmov 1   ;;  %s5981_s29 = sld [smem:[#allocation28_spill]] }
  0x9e   :  { %157 = vst.msk [vmem:[#allocation2] sm:$0xff] %vm156_vm0, %v4444_v0  ;;  %158 = vst.msk [vmem:[#allocation2 + $0x8] sm:$0xff] %vm156_vm0, %v4444_v0  ;;  %v200_v13 = vld [vmem:[#allocation6] sm:$0xff]  ;;  %v201_v14 = vld [vmem:[#allocation6 + $0x8] sm:$0xff]  ;;  %v4446_v40 = vmov 0.0|0.0   ;;  %vm167_vm5 = vcmask 326656  }
  0x9f   :  { %159 = vst.msk [vmem:[#allocation2 + $0x10] sm:$0xff] %vm156_vm0, %v4444_v0  ;;  %160 = vst.msk [vmem:[#allocation2 + $0x18] sm:$0xff] %vm156_vm0, %v4444_v0  ;;  %v202_v15 = vld [vmem:[#allocation6 + $0x10] sm:$0xff]  ;;  %v203_v16 = vld [vmem:[#allocation6 + $0x18] sm:$0xff]  ;;  %3808 = vmatprep.subr.bf16.mxu1 %v4446_v40  ;;  %vm182_vm6 = vcmask 319488   ;;  %vm1094_vm7 = vcmask 1046528  }
  0xa0   :  { %161 = vst.msk [vmem:[#allocation2 + $0x20] sm:$0xff] %vm156_vm0, %v4444_v0  ;;  %162 = vst.msk [vmem:[#allocation2 + $0x28] sm:$0xff] %vm156_vm0, %v4444_v0  ;;  %v204_v21 = vld [vmem:[#allocation6 + $0x20] sm:$0xff]  ;;  %v205_v22 = vld [vmem:[#allocation6 + $0x28] sm:$0xff]  ;;  %vm4447_vm8 = vmmov 0   ;;  %vm184_vm9 = vcmask 588800  }
  0xa1   :  { %163 = vst.msk [vmem:[#allocation2 + $0x30] sm:$0xff] %vm156_vm0, %v4444_v0  ;;  %vm4668_vm4 = vmpackc.low %vm266_vm2, %vm4445_vm3  ;;  %v206_v25 = vld [vmem:[#allocation6 + $0x30] sm:$0xff]  ;;  %v1153_v42 = vld [vmem:[%s5959_s3] sm:$0xff]  ;;  %vm1426_vm10 = vcmask 457728   ;;  %vm188_vm11 = vcmask 584704   ;;  %vm191_vm12 = vcmask 523264  }
  0xa2   :  { %165 = vst.msk [vmem:[#allocation2 + $0x38] sm:$0xf] %vm164_vm1, %v4444_v0  ;;  %v1154_v43 = vld [vmem:[%s5959_s3 + $0x8] sm:$0xff]  ;;  %v1155_v45 = vld [vmem:[%s5959_s3 + $0x10] sm:$0xff]  ;;  %v1156_v46 = vld [vmem:[%s5959_s3 + $0x18] sm:$0xff]  ;;  %vm198_vm13 = vcmask 516096  }
  0xa3   :  { %v3251_v2 = vld [vmem:[%s5981_s29 + $0x48] sm:$0xff]  ;;  %v3253_v3 = vld [vmem:[%s5981_s29 + $0x58] sm:$0xff]  ;;  %v3250_v4 = vld [vmem:[%s5981_s29 + $0x40] sm:$0xff]  ;;  %207 = vst.msk [vmem:[#allocation2] sm:$0xff] %vm156_vm0, %v200_v13  ;;  %v3809_v44 = vpack.c.bf16 %v1154_v43, %v1153_v42  ;;  %v3812_v48 = vpack.c.bf16 %v1156_v46, %v1155_v45  ;;  %vm2401_vm14 = vcmask 195584   ;;  %vm3060_vm15 = vcmask 982016  }
  0xa4   :  { %v3758_v5 = vpack.c.bf16 %v3253_v3, %v3251_v2  ;;  %v3252_v6 = vld [vmem:[%s5981_s29 + $0x50] sm:$0xff]  ;;  %v3255_v7 = vld [vmem:[%s5981_s29 + $0x68] sm:$0xff]  ;;  %v3257_v8 = vld [vmem:[%s5981_s29 + $0x78] sm:$0xf]  ;;  %208 = vst.msk [vmem:[#allocation2 + $0x8] sm:$0xff] %vm156_vm0, %v201_v14 }
  0xa5   :  { %v3760_v9 = vpack.c.bf16 %v3252_v6, %v3250_v4  ;;  %v3762_v10 = vpack.c.bf16 %v3257_v8, %v3255_v7  ;;  %v3254_v11 = vld [vmem:[%s5981_s29 + $0x60] sm:$0xff]  ;;  %v3256_v12 = vld [vmem:[%s5981_s29 + $0x70] sm:$0xf]  ;;  %209 = vst.msk [vmem:[#allocation2 + $0x10] sm:$0xff] %vm156_vm0, %v202_v15  ;;  %210 = vst.msk [vmem:[#allocation2 + $0x18] sm:$0xff] %vm156_vm0, %v203_v16  ;;  %3810 = vmatpush1.bf16.msra.mxu1 %v3809_v44 }
  0xa6   :  { %3759 = vmatprep.subr.bf16.mxu0 %v3758_v5  ;;  %v3765_v17 = vpack.c.bf16 %v3256_v12, %v3254_v11  ;;  %v222_v18 = vld [vmem:[%s5981_s29 + $0x8] sm:$0xff]  ;;  %v224_v19 = vld [vmem:[%s5981_s29 + $0x18] sm:$0xff]  ;;  %v221_v23 = vld [vmem:[%s5981_s29] sm:$0xff]  ;;  %211 = vst.msk [vmem:[#allocation2 + $0x20] sm:$0xff] %vm156_vm0, %v204_v21  ;;  %3811 = vmatprep.subr.bf16.mxu1 %v4446_v40 }
  0xa7   :  { %3761 = vmatpush1.bf16.msra.mxu0 %v3760_v9  ;;  %v3768_v20 = vpack.c.bf16 %v224_v19, %v222_v18  ;;  %v223_v24 = vld [vmem:[%s5981_s29 + $0x10] sm:$0xff]  ;;  %212 = vst.msk [vmem:[#allocation2 + $0x28] sm:$0xff] %vm156_vm0, %v205_v22  ;;  %213 = vst.msk [vmem:[#allocation2 + $0x30] sm:$0xff] %vm156_vm0, %v206_v25  ;;  %v226_v26 = vld [vmem:[%s5981_s29 + $0x28] sm:$0xff] }
  0xa8   :  { %3764 = vmatprep.subr.msk.bf16.mxu0 %vm4668_vm4, %v3762_v10  ;;  %v228_v27 = vld [vmem:[%s5981_s29 + $0x38] sm:$0xf]  ;;  %v3770_v28 = vpack.c.bf16 %v223_v24, %v221_v23  ;;  %v225_v30 = vld [vmem:[%s5981_s29 + $0x20] sm:$0xff]  ;;  %v227_v31 = vld [vmem:[%s5981_s29 + $0x30] sm:$0xf]  ;;  %168 = vst.msk [vmem:[#allocation3 + $0x8] sm:$0xff] %vm167_vm5, %v4444_v0 }
  0xa9   :  { %v3772_v29 = vpack.c.bf16 %v228_v27, %v226_v26  ;;  %v3277_v33 = vld [vmem:[%s5981_s29 + $0x88] sm:$0xff]  ;;  %v3279_v34 = vld [vmem:[%s5981_s29 + $0x98] sm:$0xff]  ;;  %v3775_v36 = vpack.c.bf16 %v227_v31, %v225_v30  ;;  %v1157_v49 = vld [vmem:[%s5959_s3 + $0x20] sm:$0xff]  ;;  %3813 = vmatpush1.bf16.msra.mxu1 %v3812_v48  ;;  %170 = vst.msk [vmem:[#allocation3 + $0x18] sm:$0xff] %vm167_vm5, %v4444_v0 }
  0xaa   :  { %v3778_v37 = vpack.c.bf16 %v3279_v34, %v3277_v33  ;;  %v1158_v50 = vld [vmem:[%s5959_s3 + $0x28] sm:$0xff]  ;;  %v3276_v52 = vld [vmem:[%s5981_s29 + $0x80] sm:$0xff]  ;;  %v3278_v53 = vld [vmem:[%s5981_s29 + $0x90] sm:$0xff]  ;;  %3814 = vmatprep.subr.bf16.mxu1 %v4446_v40  ;;  %172 = vst.msk [vmem:[#allocation3 + $0x28] sm:$0xff] %vm167_vm5, %v4444_v0 }
  0xab   :  { %3767 = vmatpush1.bf16.msk.msra.mxu0 %vm4668_vm4, %v3765_v17  ;;  %v229_v32 = vld [vmem:[#allocation2 + $0x1] sm:$0xff]  ;;  %v3815_v55 = vpack.c.bf16 %v1158_v50, %v1157_v49  ;;  %v3283_v56 = vld [vmem:[%s5981_s29 + $0xb8] sm:$0xf]  ;;  %v1159_v57 = vld [vmem:[%s5959_s3 + $0x30] sm:$0xff]  ;;  %v3780_v60 = vpack.c.bf16 %v3278_v53, %v3276_v52  ;;  %174 = vst.msk [vmem:[#allocation3 + $0x38] sm:$0xff] %vm167_vm5, %v4444_v0 }
  0xac   :  { %3769 = vmatprep.subr.bf16.mxu0 %v3768_v20  ;;  %v230_v35 = vld [vmem:[#allocation2 + $0x9] sm:$0xff]  ;;  %v231_v38 = vld [vmem:[#allocation2 + $0x11] sm:$0xff]  ;;  %v214_v59 = vld [vmem:[#allocation2] sm:$0xff]  ;;  %176 = vst.msk [vmem:[#allocation3 + $0x48] sm:$0xff] %vm167_vm5, %v4444_v0 }
  0xad   :  { %v232_v39 = vld [vmem:[#allocation2 + $0x19] sm:$0xff]  ;;  %v3281_v54 = vld [vmem:[%s5981_s29 + $0xa8] sm:$0xff]  ;;  %v3282_v63 = vld [vmem:[%s5981_s29 + $0xb0] sm:$0xf]  ;;  %3816 = vmatpush1.bf16.msra.mxu1 %v3815_v55  ;;  %178 = vst.msk [vmem:[#allocation3 + $0x58] sm:$0xff] %vm167_vm5, %v4444_v0 }
  0xae   :  { %3260 = vmatmul.mubr.msk.f32.vlgmr.msra.gmra.mrb[0].mxu0 %vm156_vm0, %v229_v32  ;;  %v233_v41 = vld [vmem:[#allocation2 + $0x21] sm:$0xff]  ;;  %v234_v47 = vld [vmem:[#allocation2 + $0x29] sm:$0xff]  ;;  %v235_v51 = vld [vmem:[#allocation2 + $0x31] sm:$0xff]  ;;  %v3782_v61 = vpack.c.bf16 %v3283_v56, %v3281_v54  ;;  %3817 = vmatprep.subr.bf16.mxu1 %v4446_v40  ;;  %180 = vst.msk [vmem:[#allocation3 + $0x68] sm:$0xff] %vm167_vm5, %v4444_v0 }
  0xaf   :  { %343 = vmatprep.mubr.f32.mxu0 %v4444_v0  ;;  %3771 = vmatpush1.bf16.msra.mxu0 %v3770_v28  ;;  %v1160_v58 = vld [vmem:[%s5959_s3 + $0x38] sm:$0xff]  ;;  %v3280_v62 = vld [vmem:[%s5981_s29 + $0xa0] sm:$0xff]  ;;  %v3294_v2 = vld [vmem:[%s5981_s29 + $0xc8] sm:$0xff]  ;;  %183 = vst.msk [vmem:[#allocation3 + $0x78] sm:$0x1] %vm182_vm6, %v4444_v0 }
  0xb0   :  { %3774 = vmatprep.subr.msk.bf16.mxu0 %vm4668_vm4, %v3772_v29  ;;  %v3818_v3 = vpack.c.bf16 %v1160_v58, %v1159_v57  ;;  %v3296_v4 = vld [vmem:[%s5981_s29 + $0xd8] sm:$0xff]  ;;  %v1161_v5 = vld [vmem:[%s5959_s3 + $0x40] sm:$0xff]  ;;  %v1162_v6 = vld [vmem:[%s5959_s3 + $0x48] sm:$0xff]  ;;  %v3785_v8 = vpack.c.bf16 %v3282_v63, %v3280_v62  ;;  %185 = vst.msk [vmem:[#allocation4] sm:$0xff] %vm184_vm9, %v4444_v0 }
  0xb1   :  { %v215_v7 = vld [vmem:[#allocation2 + $0x8] sm:$0xff]  ;;  %v3788_v9 = vpack.c.bf16 %v3296_v4, %v3294_v2  ;;  %v3821_v10 = vpack.c.bf16 %v1162_v6, %v1161_v5  ;;  %v216_v11 = vld [vmem:[#allocation2 + $0x10] sm:$0xff]  ;;  %v217_v12 = vld [vmem:[#allocation2 + $0x18] sm:$0xff]  ;;  %186 = vst.msk [vmem:[#allocation4 + $0x8] sm:$0xff] %vm184_vm9, %v4444_v0 }
  0xb2   :  { %3261 = vmatmul.mubr.msk.f32.gmra.mrb[2].mxu0 %vm156_vm0, %v230_v35  ;;  %3819 = vmatpush1.bf16.msra.mxu1 %v3818_v3  ;;  %v218_v13 = vld [vmem:[#allocation2 + $0x20] sm:$0xff]  ;;  %v219_v14 = vld [vmem:[#allocation2 + $0x28] sm:$0xff]  ;;  %v220_v15 = vld [vmem:[#allocation2 + $0x30] sm:$0xff]  ;;  %187 = vst.msk [vmem:[#allocation4 + $0x10] sm:$0xff] %vm184_vm9, %v4444_v0 }
  0xb3   :  { %349 = vmatprep.mubr.f32.mxu0 %v4444_v0  ;;  %3777 = vmatpush1.bf16.msk.msra.mxu0 %vm4668_vm4, %v3775_v36  ;;  %v3293_v16 = vld [vmem:[%s5981_s29 + $0xc0] sm:$0xff]  ;;  %v3295_v17 = vld [vmem:[%s5981_s29 + $0xd0] sm:$0xff]  ;;  %v3298_v18 = vld [vmem:[%s5981_s29 + $0xe8] sm:$0xff]  ;;  %189 = vst.msk [vmem:[#allocation4 + $0x18] sm:$0xf] %vm188_vm11, %v4444_v0 }
  0xb4   :  { %3779 = vmatprep.subr.bf16.mxu0 %v3778_v37  ;;  %3820 = vmatprep.subr.bf16.mxu1 %v4446_v40  ;;  %v3300_v19 = vld [vmem:[%s5981_s29 + $0xf8] sm:$0xf]  ;;  %v514_v20 = vld [vmem:[#allocation2 + $0x2] sm:$0xff]  ;;  %v3790_v21 = vpack.c.bf16 %v3295_v17, %v3293_v16  ;;  %v3299_v24 = vld [vmem:[%s5981_s29 + $0xf0] sm:$0xf]  ;;  %192 = vst.msk [vmem:[#allocation5 + $0x8] sm:$0xff] %vm191_vm12, %v4444_v0 }
  0xb5   :  { %v3792_v22 = vpack.c.bf16 %v3300_v19, %v3298_v18  ;;  %v3297_v23 = vld [vmem:[%s5981_s29 + $0xe0] sm:$0xff]  ;;  %v3311_v25 = vld [vmem:[%s5981_s29 + $0x108] sm:$0xff]  ;;  %v3313_v26 = vld [vmem:[%s5981_s29 + $0x118] sm:$0xff]  ;;  %194 = vst.msk [vmem:[#allocation5 + $0x18] sm:$0xff] %vm191_vm12, %v4444_v0 }
  0xb6   :  { %3262 = vmatmul.mubr.msk.f32.gmra.mrb[4].mxu0 %vm156_vm0, %v231_v38  ;;  %3822 = vmatpush1.bf16.msra.mxu1 %v3821_v10  ;;  %v515_v27 = vld [vmem:[#allocation2 + $0xa] sm:$0xff]  ;;  %v3795_v28 = vpack.c.bf16 %v3299_v24, %v3297_v23  ;;  %v3798_v29 = vpack.c.bf16 %v3313_v26, %v3311_v25  ;;  %v516_v30 = vld [vmem:[#allocation2 + $0x12] sm:$0xff]  ;;  %v517_v31 = vld [vmem:[#allocation2 + $0x1a] sm:$0xff]  ;;  %196 = vst.msk [vmem:[#allocation5 + $0x28] sm:$0xff] %vm191_vm12, %v4444_v0 }
  0xb7   :  { %355 = vmatprep.mubr.f32.mxu0 %v4444_v0  ;;  %3823 = vmatprep.subr.bf16.mxu1 %v4446_v40  ;;  %v518_v32 = vld [vmem:[#allocation2 + $0x22] sm:$0xff]  ;;  %v519_v33 = vld [vmem:[#allocation2 + $0x2a] sm:$0xff]  ;;  %v520_v34 = vld [vmem:[#allocation2 + $0x32] sm:$0xff]  ;;  %199 = vst.msk [vmem:[#allocation5 + $0x38] sm:$0x1] %vm198_vm13, %v4444_v0 }
  0xb8   :  { %v3310_v35 = vld [vmem:[%s5981_s29 + $0x100] sm:$0xff]  ;;  %v3312_v36 = vld [vmem:[%s5981_s29 + $0x110] sm:$0xff]  ;;  %v3315_v37 = vld [vmem:[%s5981_s29 + $0x128] sm:$0xff] }
  0xb9   :  { %v3317_v38 = vld [vmem:[%s5981_s29 + $0x138] sm:$0xf]  ;;  %v3314_v43 = vld [vmem:[%s5981_s29 + $0x120] sm:$0xff]  ;;  %v3316_v44 = vld [vmem:[%s5981_s29 + $0x130] sm:$0xf] }
  0xba   :  { %3263 = vmatmul.mubr.msk.f32.gmra.mrb[6].mxu0 %vm156_vm0, %v232_v39  ;;  %v678_v39 = vld [vmem:[#allocation2 + $0x3] sm:$0xff]  ;;  %v3802_v42 = vpack.c.bf16 %v3317_v38, %v3315_v37  ;;  %v679_v45 = vld [vmem:[#allocation2 + $0xb] sm:$0xff]  ;;  %v3805_v46 = vpack.c.bf16 %v3316_v44, %v3314_v43  ;;  %v681_v48 = vld [vmem:[#allocation2 + $0x1b] sm:$0xff] }
  0xbb   :  { %361 = vmatprep.mubr.f32.mxu0 %v4444_v0  ;;  %v682_v49 = vld [vmem:[#allocation2 + $0x23] sm:$0xff]  ;;  %v683_v50 = vld [vmem:[#allocation2 + $0x2b] sm:$0xff]  ;;  %v684_v1 = vld [vmem:[#allocation2 + $0x33] sm:$0xff] }
  0xbc   :  { %v843_v52 = vld [vmem:[#allocation2 + $0xc] sm:$0xff]  ;;  %v844_v53 = vld [vmem:[#allocation2 + $0x14] sm:$0xff]  ;;  %v845_v54 = vld [vmem:[#allocation2 + $0x1c] sm:$0xff] }
  0xbd   :  { %v846_v55 = vld [vmem:[#allocation2 + $0x24] sm:$0xff]  ;;  %v847_v56 = vld [vmem:[#allocation2 + $0x2c] sm:$0xff]  ;;  %v848_v57 = vld [vmem:[#allocation2 + $0x34] sm:$0xff] }
  0xbe   :  { %3264 = vmatmul.mubr.msk.f32.gmra.mrb[8].mxu0 %vm156_vm0, %v233_v41  ;;  %v3800_v41 = vpack.c.bf16 %v3312_v36, %v3310_v35  ;;  %v1163_v58 = vld [vmem:[%s5959_s3 + $0x50] sm:$0xff]  ;;  %v1166_v62 = vld [vmem:[%s5959_s3 + $0x68] sm:$0xff]  ;;  %v1168_v3 = vld [vmem:[%s5959_s3 + $0x78] sm:$0xff] }
  0xbf   :  { %367 = vmatprep.mubr.f32.mxu0 %v4444_v0  ;;  %v1167_v2 = vld [vmem:[%s5959_s3 + $0x70] sm:$0xff]  ;;  %v1169_v5 = vld [vmem:[%s5959_s3 + $0x80] sm:$0xff]  ;;  %v1170_v6 = vld [vmem:[%s5959_s3 + $0x88] sm:$0xff] }
  0xc0   :  { %v3830_v4 = vpack.c.bf16 %v1168_v3, %v1167_v2 }
  0xc2   :  { %3265 = vmatmul.mubr.msk.f32.gmra.mrb[10].mxu0 %vm156_vm0, %v234_v47  ;;  %v680_v47 = vld [vmem:[#allocation2 + $0x13] sm:$0xff] }
  0xc3   :  { %373 = vmatprep.mubr.f32.mxu0 %v4444_v0 }
  0xc6   :  { %3266 = vmatmul.mubr.msk.f32.gmra.mrb[12].mxu0 %vm156_vm0, %v235_v51  ;;  %v842_v51 = vld [vmem:[#allocation2 + $0x4] sm:$0xff] }
  0xc7   :  { %471 = vmatprep.mubr.f32.mxu0 %v4444_v0 }
  0xca   :  { %3269 = vmatmul.mubr.msk.f32.vlgmr.msra.gmra.mrb[0].mxu0 %vm156_vm0, %v214_v59  ;;  %v1164_v59 = vld [vmem:[%s5959_s3 + $0x58] sm:$0xff] }
  0xcb   :  { %477 = vmatprep.mubr.f32.mxu0 %v4444_v0  ;;  %3781 = vmatpush1.bf16.msra.mxu0 %v3780_v60  ;;  %v3824_v60 = vpack.c.bf16 %v1164_v59, %v1163_v58 }
  0xcc   :  { %3784 = vmatprep.subr.msk.bf16.mxu0 %vm4668_vm4, %v3782_v61  ;;  %v1165_v61 = vld [vmem:[%s5959_s3 + $0x60] sm:$0xff] }
  0xcd   :  { %3825 = vmatpush1.bf16.msra.mxu1 %v3824_v60  ;;  %v3827_v63 = vpack.c.bf16 %v1166_v62, %v1165_v61  ;;  %v1295_v60 = vld [vmem:[%s5960_s4] sm:$0xff]  ;;  %v1296_v61 = vld [vmem:[%s5960_s4 + $0x8] sm:$0xff] }
  0xce   :  { %3270 = vmatmul.mubr.msk.f32.gmra.mrb[2].mxu0 %vm156_vm0, %v215_v7  ;;  %3826 = vmatprep.subr.bf16.mxu1 %v4446_v40  ;;  %v3833_v7 = vpack.c.bf16 %v1170_v6, %v1169_v5 }
  0xcf   :  { %483 = vmatprep.mubr.f32.mxu0 %v4444_v0  ;;  %3787 = vmatpush1.bf16.msk.msra.mxu0 %vm4668_vm4, %v3785_v8  ;;  %v1171_v8 = vld [vmem:[%s5959_s3 + $0x90] sm:$0xff] }
  0xd0   :  { %3789 = vmatprep.subr.bf16.mxu0 %v3788_v9  ;;  %v1172_v9 = vld [vmem:[%s5959_s3 + $0x98] sm:$0xff] }
  0xd1   :  { %3828 = vmatpush1.bf16.msra.mxu1 %v3827_v63  ;;  %v3836_v10 = vpack.c.bf16 %v1172_v9, %v1171_v8 }
  0xd2   :  { %3271 = vmatmul.mubr.msk.f32.gmra.mrb[4].mxu0 %vm156_vm0, %v216_v11  ;;  %3829 = vmatprep.subr.bf16.mxu1 %v4446_v40  ;;  %v1173_v11 = vld [vmem:[%s5959_s3 + $0xa0] sm:$0xff] }
  0xd3   :  { %489 = vmatprep.mubr.f32.mxu0 %v4444_v0 }
  0xd5   :  { %3831 = vmatpush1.bf16.msra.mxu1 %v3830_v4 }
  0xd6   :  { %3272 = vmatmul.mubr.msk.f32.gmra.mrb[6].mxu0 %vm156_vm0, %v217_v12  ;;  %3832 = vmatprep.subr.bf16.mxu1 %v4446_v40  ;;  %v1008_v12 = vlaneseq }
  0xd7   :  { %495 = vmatprep.mubr.f32.mxu0 %v4444_v0 }
  0xd9   :  { %3834 = vmatpush1.bf16.msra.mxu1 %v3833_v7 }
  0xda   :  { %3273 = vmatmul.mubr.msk.f32.gmra.mrb[8].mxu0 %vm156_vm0, %v218_v13  ;;  %3835 = vmatprep.subr.bf16.mxu1 %v4446_v40  ;;  %v4979_v13 = vshrl.u32 %v1008_v12, 7 }
  0xdb   :  { %501 = vmatprep.mubr.f32.mxu0 %v4444_v0 }
  0xdc   :  { %v1014_v16 = vsub.s32 1, %v4979_v13 }
  0xdd   :  { %3837 = vmatpush1.bf16.msra.mxu1 %v3836_v10  ;;  %v3839_v10 = vpack.c.bf16 %v1296_v61, %v1295_v60 }
  0xde   :  { %3274 = vmatmul.mubr.msk.f32.gmra.mrb[10].mxu0 %vm156_vm0, %v219_v14  ;;  %1235 = vmatprep.subr.mxu1 %v4444_v0  ;;  %v1010_v14 = vsub.s32 0, %v4979_v13 }
  0xdf   :  { %507 = vmatprep.mubr.f32.mxu0 %v4444_v0 }
  0xe1   :  { %1236 = vmatpush1.msra.mxu1 %v1173_v11 }
  0xe2   :  { %3275 = vmatmul.mubr.msk.f32.gmra.mrb[12].mxu0 %vm156_vm0, %v220_v15  ;;  %3838 = vmatprep.subr.bf16.mxu1 %v4446_v40  ;;  %v1006_v15 = vld [vmem:[#allocation9] sm:$0x3] }
  0xe3   :  { %621 = vmatprep.mubr.f32.mxu0 %v4444_v0  ;;  %v4985_v17 = vrot.slane %v1006_v15, %v1010_v14  ;;  %v4989_v18 = vrot.slane %v1006_v15, %v1014_v16 }
  0xe6   :  { %3286 = vmatmul.mubr.msk.f32.vlgmr.msra.gmra.mrb[0].mxu0 %vm156_vm0, %v514_v20 }
  0xe7   :  { %627 = vmatprep.mubr.f32.mxu0 %v4444_v0  ;;  %3791 = vmatpush1.bf16.msra.mxu0 %v3790_v21 }
  0xe8   :  { %3794 = vmatprep.subr.msk.bf16.mxu0 %vm4668_vm4, %v3792_v22 }
  0xea   :  { %3287 = vmatmul.mubr.msk.f32.gmra.mrb[2].mxu0 %vm156_vm0, %v515_v27 }
  0xeb   :  { %633 = vmatprep.mubr.f32.mxu0 %v4444_v0  ;;  %3797 = vmatpush1.bf16.msk.msra.mxu0 %vm4668_vm4, %v3795_v28 }
  0xec   :  { %3799 = vmatprep.subr.bf16.mxu0 %v3798_v29 }
  0xee   :  { %3288 = vmatmul.mubr.msk.f32.gmra.mrb[4].mxu0 %vm156_vm0, %v516_v30 }
  0xef   :  { %639 = vmatprep.mubr.f32.mxu0 %v4444_v0 }
  0xf2   :  { %3289 = vmatmul.mubr.msk.f32.gmra.mrb[6].mxu0 %vm156_vm0, %v517_v31 }
  0xf3   :  { %645 = vmatprep.mubr.f32.mxu0 %v4444_v0 }
  0xf6   :  { %3290 = vmatmul.mubr.msk.f32.gmra.mrb[8].mxu0 %vm156_vm0, %v518_v32 }
  0xf7   :  { %651 = vmatprep.mubr.f32.mxu0 %v4444_v0 }
  0xfa   :  { %3291 = vmatmul.mubr.msk.f32.gmra.mrb[10].mxu0 %vm156_vm0, %v519_v33 }
  0xfb   :  { %657 = vmatprep.mubr.f32.mxu0 %v4444_v0 }
  0xfe   :  { %3292 = vmatmul.mubr.msk.f32.gmra.mrb[12].mxu0 %vm156_vm0, %v520_v34 }
  0xff   :  { %785 = vmatprep.mubr.f32.mxu0 %v4444_v0 }
 0x102   :  { %3303 = vmatmul.mubr.msk.f32.vlgmr.msra.gmra.mrb[0].mxu0 %vm156_vm0, %v678_v39 }
 0x103   :  { %791 = vmatprep.mubr.f32.mxu0 %v4444_v0  ;;  %3801 = vmatpush1.bf16.msra.mxu0 %v3800_v41 }
 0x104   :  { %3804 = vmatprep.subr.msk.bf16.mxu0 %vm4668_vm4, %v3802_v42 }
 0x106   :  { %3304 = vmatmul.mubr.msk.f32.gmra.mrb[2].mxu0 %vm156_vm0, %v679_v45 }
 0x107   :  { %797 = vmatprep.mubr.f32.mxu0 %v4444_v0  ;;  %3807 = vmatpush1.bf16.msk.msra.mxu0 %vm4668_vm4, %v3805_v46 }
 0x108   :  { %3957 = vmatprep.subr.bf16.mxu0 %v4446_v40 }
 0x10a   :  { %3305 = vmatmul.mubr.msk.f32.gmra.mrb[4].mxu0 %vm156_vm0, %v680_v47 }
 0x10b   :  { %803 = vmatprep.mubr.f32.mxu0 %v4444_v0 }
 0x10e   :  { %3306 = vmatmul.mubr.msk.f32.gmra.mrb[6].mxu0 %vm156_vm0, %v681_v48 }
 0x10f   :  { %809 = vmatprep.mubr.f32.mxu0 %v4444_v0 }
 0x112   :  { %3307 = vmatmul.mubr.msk.f32.gmra.mrb[8].mxu0 %vm156_vm0, %v682_v49 }
 0x113   :  { %815 = vmatprep.mubr.f32.mxu0 %v4444_v0 }
 0x116   :  { %3308 = vmatmul.mubr.msk.f32.gmra.mrb[10].mxu0 %vm156_vm0, %v683_v50 }
 0x117   :  { %821 = vmatprep.mubr.f32.mxu0 %v4444_v0 }
 0x11a   :  { %3309 = vmatmul.mubr.msk.f32.gmra.mrb[12].mxu0 %vm156_vm0, %v684_v1 }
 0x11b   :  { %949 = vmatprep.mubr.f32.mxu0 %v4444_v0 }
 0x11e   :  { %3320 = vmatmul.mubr.msk.f32.vlgmr.msra.gmra.mrb[0].mxu0 %vm156_vm0, %v842_v51 }
 0x11f   :  { %955 = vmatprep.mubr.f32.mxu0 %v4444_v0 }
 0x122   :  { %3321 = vmatmul.mubr.msk.f32.gmra.mrb[2].mxu0 %vm156_vm0, %v843_v52 }
 0x123   :  { %961 = vmatprep.mubr.f32.mxu0 %v4444_v0 }
 0x126   :  { %3322 = vmatmul.mubr.msk.f32.gmra.mrb[4].mxu0 %vm156_vm0, %v844_v53 }
 0x127   :  { %967 = vmatprep.mubr.f32.mxu0 %v4444_v0 }
 0x12a   :  { %3323 = vmatmul.mubr.msk.f32.gmra.mrb[6].mxu0 %vm156_vm0, %v845_v54 }
 0x12b   :  { %973 = vmatprep.mubr.f32.mxu0 %v4444_v0 }
 0x12e   :  { %3324 = vmatmul.mubr.msk.f32.gmra.mrb[8].mxu0 %vm156_vm0, %v846_v55 }
 0x12f   :  { %979 = vmatprep.mubr.f32.mxu0 %v4444_v0 }
 0x132   :  { %3325 = vmatmul.mubr.msk.f32.gmra.mrb[10].mxu0 %vm156_vm0, %v847_v56 }
 0x133   :  { %985 = vmatprep.mubr.f32.mxu0 %v4444_v0 }
 0x136   :  { %3326 = vmatmul.mubr.msk.f32.gmra.mrb[12].mxu0 %vm156_vm0, %v848_v57  ;;  %vm3153_vm0 = vcmask 687104  }
 0x1f1   :  { %v951_v19 = vpop.f32.mrb[0].mxu0 }
 0x1f2   :  { %v1018_v20 = vadd.f32 %v4985_v17, %v951_v19  ;;  %v953_v21 = vpop.f32.mrb[1].mxu0 }
 0x1f3   :  { %v1019_v22 = vadd.f32 %v4989_v18, %v953_v21  ;;  %v1298_v21 = vld [vmem:[%s5960_s4 + $0x18] sm:$0xff] }
 0x1f4   :  { %v1032_v23 = vmax.f32 %v1018_v20, 0.0  ;;  %v1297_v20 = vld [vmem:[%s5960_s4 + $0x10] sm:$0xff] }
 0x1f5   :  { %v1033_v24 = vmax.f32 %v1019_v22, 0.0  ;;  %v957_v25 = vpop.f32.mrb[2].mxu0 }
 0x1f6   :  { %1046 = vst [vmem:[#allocation3] sm:$0xff] %v1032_v23  ;;  %v1020_v26 = vadd.f32 %v4985_v17, %v957_v25  ;;  %v959_v27 = vpop.f32.mrb[3].mxu0 }
 0x1f7   :  { %1047 = vst.msk [vmem:[#allocation3 + $0x8] sm:$0xff] %vm167_vm5, %v1033_v24  ;;  %v1021_v28 = vadd.f32 %v4989_v18, %v959_v27 }
 0x1f8   :  { %v1034_v29 = vmax.f32 %v1020_v26, 0.0 }
 0x1f9   :  { %v1035_v30 = vmax.f32 %v1021_v28, 0.0  ;;  %v963_v31 = vpop.f32.mrb[4].mxu0 }
 0x1fa   :  { %v1022_v32 = vadd.f32 %v4985_v17, %v963_v31  ;;  %v965_v33 = vpop.f32.mrb[5].mxu0  ;;  %v1096_v43 = vrot.slane %v1034_v29, 1  ;;  %v3842_v31 = vpack.c.bf16 %v1298_v21, %v1297_v20  ;;  %v1308_v20 = vld [vmem:[%s5960_s4 + $0x68] sm:$0xff] }
 0x1fb   :  { %1049 = vst.msk [vmem:[#allocation3 + $0x18] sm:$0xff] %vm167_vm5, %v1035_v30  ;;  %v1023_v34 = vadd.f32 %v4989_v18, %v965_v33 }
 0x1fc   :  { %v1036_v35 = vmax.f32 %v1022_v32, 0.0 }
 0x1fd   :  { %v1037_v36 = vmax.f32 %v1023_v34, 0.0  ;;  %v969_v37 = vpop.f32.mrb[6].mxu0  ;;  %v1074_v38 = vld [vmem:[#allocation3] sm:$0xfe] }
 0x1fe   :  { %v1024_v39 = vadd.f32 %v4985_v17, %v969_v37  ;;  %v971_v41 = vpop.f32.mrb[7].mxu0  ;;  %v1095_v42 = vrot.slane %v1074_v38, 1  ;;  %v1101_v44 = vrot.slane %v1036_v35, 1  ;;  %v1075_v47 = vld [vmem:[#allocation3 + $0x8] sm:$0xfe] }
 0x1ff   :  { %1051 = vst.msk [vmem:[#allocation3 + $0x28] sm:$0xff] %vm167_vm5, %v1037_v36  ;;  %v1025_v45 = vadd.f32 %v4989_v18, %v971_v41  ;;  %v1098_v58 = vrot.slane %v1075_v47, 1  ;;  %v1061_v4 = vld [vmem:[#allocation3 + $0x8] sm:$0xff]  ;;  %v1299_v36 = vld [vmem:[%s5960_s4 + $0x20] sm:$0xff]  ;;  %v1301_v47 = vld [vmem:[%s5960_s4 + $0x30] sm:$0xff] }
 0x200   :  { %v1038_v46 = vmax.f32 %v1024_v39, 0.0  ;;  %v1097_v48 = vsel %vm1094_vm7, %v1095_v42, %v1096_v43  ;;  %v1102_v49 = vsel %vm1094_vm7, %v1096_v43, %v1101_v44 }
 0x201   :  { %v1039_v50 = vmax.f32 %v1025_v45, 0.0  ;;  %v975_v1 = vpop.f32.mrb[8].mxu0  ;;  %v5004_v51 = vmax.f32 %v1032_v23, %v1097_v48  ;;  %v5006_v52 = vmax.f32 %v1034_v29, %v1102_v49  ;;  %v1302_v48 = vld [vmem:[%s5960_s4 + $0x38] sm:$0xff] }
 0x202   :  { %v1026_v53 = vadd.f32 %v4985_v17, %v975_v1  ;;  %v977_v54 = vpop.f32.mrb[9].mxu0  ;;  %v1063_v55 = vld [vmem:[#allocation3 + $0x18] sm:$0xff]  ;;  %v1105_v56 = vrot.slane %v1038_v46, 1 }
 0x203   :  { %1053 = vst.msk [vmem:[#allocation3 + $0x38] sm:$0xff] %vm167_vm5, %v1039_v50  ;;  %v1027_v57 = vadd.f32 %v4989_v18, %v977_v54  ;;  %v1099_v59 = vrot.slane %v1063_v55, 1  ;;  %v3848_v54 = vpack.c.bf16 %v1302_v48, %v1301_v47 }
 0x204   :  { %v1040_v62 = vmax.f32 %v1026_v53, 0.0  ;;  %v1106_v63 = vsel %vm1094_vm7, %v1101_v44, %v1105_v56 }
 0x205   :  { %v1041_v2 = vmax.f32 %v1027_v57, 0.0  ;;  %v981_v3 = vpop.f32.mrb[10].mxu0  ;;  %v1100_v5 = vsel %vm1094_vm7, %v1098_v58, %v1099_v59  ;;  %v5019_v6 = vmax.f32 %v1036_v35, %v1106_v63  ;;  %v1303_v58 = vld [vmem:[%s5960_s4 + $0x40] sm:$0xff] }
 0x206   :  { %v1028_v7 = vadd.f32 %v4985_v17, %v981_v3  ;;  %v983_v8 = vpop.f32.mrb[11].mxu0  ;;  %v5022_v9 = vmax.f32 %v1061_v4, %v1100_v5  ;;  %v1065_v11 = vld [vmem:[#allocation3 + $0x28] sm:$0xff]  ;;  %v1109_v12 = vrot.slane %v1040_v62, 1  ;;  %v1305_v5 = vld [vmem:[%s5960_s4 + $0x50] sm:$0xff] }
 0x207   :  { %1055 = vst.msk [vmem:[#allocation3 + $0x48] sm:$0xff] %vm167_vm5, %v1041_v2  ;;  %v1029_v15 = vadd.f32 %v4989_v18, %v983_v8  ;;  %v1103_v19 = vrot.slane %v1065_v11, 1 }
 0x208   :  { %v1042_v22 = vmax.f32 %v1028_v7, 0.0  ;;  %3327 = vmatprep.mubr.msk.f32.mxu1 %vm167_vm5, %v5022_v9  ;;  %v1110_v23 = vsel %vm1094_vm7, %v1105_v56, %v1109_v12  ;;  %v1077_v56 = vld [vmem:[#allocation3 + $0x78] sm:$0x1] }
 0x209   :  { %v1043_v24 = vmax.f32 %v1029_v15, 0.0  ;;  %v987_v25 = vpop.f32.mrb[12].mxu0  ;;  %1260 = vmatmul.mubr.f32.vlgmr.msra.gmra.mrb[0].mxu1 %v5004_v51  ;;  %v1104_v26 = vsel %vm1094_vm7, %v1099_v59, %v1103_v19  ;;  %v5037_v27 = vmax.f32 %v1038_v46, %v1110_v23  ;;  %v1304_v59 = vld [vmem:[%s5960_s4 + $0x48] sm:$0xff]  ;;  %v1123_v61 = vrot.slane %v1077_v56, 1  ;;  %v1306_v7 = vld [vmem:[%s5960_s4 + $0x58] sm:$0xff] }
 0x20a   :  { %v5040_v28 = vadd.f32 %v4985_v17, %v987_v25  ;;  %3840 = vmatpush1.bf16.msra.mxu1 %v3839_v10  ;;  %v989_v29 = vpop.f32.mrb[13].mxu0  ;;  %v5042_v30 = vmax.f32 %v1063_v55, %v1104_v26  ;;  %v1067_v32 = vld [vmem:[#allocation3 + $0x38] sm:$0xff]  ;;  %v1113_v33 = vrot.slane %v1042_v22, 1  ;;  %v1300_v17 = vld [vmem:[%s5960_s4 + $0x28] sm:$0xff]  ;;  %v3851_v2 = vpack.c.bf16 %v1304_v59, %v1303_v58  ;;  %v1309_v25 = vld [vmem:[%s5960_s4 + $0x70] sm:$0xff] }
 0x20b   :  { %1057 = vst.msk [vmem:[#allocation3 + $0x58] sm:$0xff] %vm167_vm5, %v1043_v24  ;;  %v1031_v34 = vadd.f32 %v4989_v18, %v989_v29  ;;  %3841 = vmatprep.subr.bf16.mxu1 %v4446_v40  ;;  %v1107_v35 = vrot.slane %v1067_v32, 1  ;;  %v3845_v43 = vpack.c.bf16 %v1300_v17, %v1299_v36  ;;  %v3854_v15 = vpack.c.bf16 %v1306_v7, %v1305_v5  ;;  %v1310_v26 = vld [vmem:[%s5960_s4 + $0x78] sm:$0xff]  ;;  %v3347_v5 = vld [vmem:[%s5962_s6 + $0xa8] sm:$0xff] }
 0x20c   :  { %v1044_v37 = vmax.f32 %v5040_v28, 0.0  ;;  %3328 = vmatprep.mubr.msk.f32.mxu1 %vm167_vm5, %v5042_v30  ;;  %v1114_v38 = vsel %vm1094_vm7, %v1109_v12, %v1113_v33  ;;  %v3860_v29 = vpack.c.bf16 %v1310_v26, %v1309_v25  ;;  %v1311_v28 = vld [vmem:[%s5960_s4 + $0x80] sm:$0xff] }
 0x20d   :  { %v1045_v39 = vmax.f32 %v1031_v34, 0.0  ;;  %1265 = vmatmul.mubr.f32.gmra.mrb[2].mxu1 %v5006_v52  ;;  %v1108_v18 = vsel %vm1094_vm7, %v1103_v19, %v1107_v35  ;;  %v5059_v41 = vmax.f32 %v1040_v62, %v1114_v38  ;;  %v1076_v62 = vld [vmem:[#allocation3 + $0x70] sm:$0x1]  ;;  %v1307_v19 = vld [vmem:[%s5960_s4 + $0x60] sm:$0xff] }
 0x20e   :  { %3843 = vmatpush1.bf16.msra.mxu1 %v3842_v31  ;;  %v5061_v42 = vmax.f32 %v1065_v11, %v1108_v18  ;;  %v1069_v44 = vld [vmem:[#allocation3 + $0x48] sm:$0xff]  ;;  %v1117_v45 = vrot.slane %v1044_v37, 1  ;;  %v1121_v8 = vrot.slane %v1076_v62, 1  ;;  %v3857_v23 = vpack.c.bf16 %v1308_v20, %v1307_v19  ;;  %v3350_v25 = vld [vmem:[%s5962_s6 + $0xc0] sm:$0xff] }
 0x20f   :  { %1059 = vst.msk [vmem:[#allocation3 + $0x68] sm:$0xff] %vm167_vm5, %v1045_v39  ;;  %3844 = vmatprep.subr.bf16.mxu1 %v4446_v40  ;;  %v1111_v46 = vrot.slane %v1069_v44, 1  ;;  %v1312_v31 = vld [vmem:[%s5960_s4 + $0x88] sm:$0xff] }
 0x210   :  { %3329 = vmatprep.mubr.msk.f32.mxu1 %vm167_vm5, %v5061_v42  ;;  %v1118_v49 = vsel %vm1094_vm7, %v1113_v33, %v1117_v45  ;;  %v1313_v33 = vld [vmem:[%s5960_s4 + $0x90] sm:$0xff]  ;;  %v3351_v19 = vld [vmem:[%s5962_s6 + $0xc8] sm:$0xff] }
 0x211   :  { %1270 = vmatmul.mubr.f32.gmra.mrb[4].mxu1 %v5019_v6  ;;  %v1112_v50 = vsel %vm1094_vm7, %v1107_v35, %v1111_v46  ;;  %v5078_v1 = vmax.f32 %v1042_v22, %v1118_v49  ;;  %v1122_v22 = vsel %vm1094_vm7, %v1117_v45, %v1121_v8  ;;  %v1315_v35 = vld [vmem:[%s5960_s4 + $0xa0] sm:$0xff]  ;;  %v3344_v8 = vld [vmem:[%s5962_s6 + $0x90] sm:$0xff] }
 0x212   :  { %3846 = vmatpush1.bf16.msra.mxu1 %v3845_v43  ;;  %v5080_v53 = vmax.f32 %v1067_v32, %v1112_v50  ;;  %v1071_v55 = vld [vmem:[#allocation3 + $0x58] sm:$0xff]  ;;  %v1151_v24 = vmax.f32 %v1044_v37, %v1122_v22  ;;  %v3863_v32 = vpack.c.bf16 %v1312_v31, %v1311_v28  ;;  %v1424_v26 = vld [vmem:[#allocation11 + $0x8] sm:$0xff]  ;;  %v1425_v28 = vld [vmem:[#allocation11 + $0x10] sm:$0xff] }
 0x213   :  { %3847 = vmatprep.subr.bf16.mxu1 %v4446_v40  ;;  %v1115_v57 = vrot.slane %v1071_v55, 1  ;;  %v3353_v31 = vld [vmem:[%s5962_s6 + $0xd8] sm:$0xff] }
 0x214   :  { %3330 = vmatprep.mubr.msk.f32.mxu1 %vm167_vm5, %v5080_v53 }
 0x215   :  { %1275 = vmatmul.mubr.f32.gmra.mrb[6].mxu1 %v5037_v27  ;;  %v1116_v60 = vsel %vm1094_vm7, %v1111_v46, %v1115_v57 }
 0x216   :  { %3849 = vmatpush1.bf16.msra.mxu1 %v3848_v54  ;;  %v1148_v63 = vmax.f32 %v1069_v44, %v1116_v60  ;;  %v1073_v3 = vld [vmem:[#allocation3 + $0x68] sm:$0xff] }
 0x217   :  { %3850 = vmatprep.subr.bf16.mxu1 %v4446_v40  ;;  %v1119_v4 = vrot.slane %v1073_v3, 1 }
 0x218   :  { %3331 = vmatprep.mubr.msk.f32.mxu1 %vm167_vm5, %v1148_v63 }
 0x219   :  { %1280 = vmatmul.mubr.f32.gmra.mrb[8].mxu1 %v5059_v41  ;;  %v1120_v10 = vsel %vm1094_vm7, %v1115_v57, %v1119_v4  ;;  %v1124_v11 = vsel %vm1094_vm7, %v1119_v4, %v1123_v61  ;;  %v3345_v4 = vld [vmem:[%s5962_s6 + $0x98] sm:$0xff] }
 0x21a   :  { %3852 = vmatpush1.bf16.msra.mxu1 %v3851_v2  ;;  %v1150_v12 = vmax.f32 %v1071_v55, %v1120_v10  ;;  %v1152_v21 = vmax.f32 %v1073_v3, %v1124_v11  ;;  %v3346_v10 = vld [vmem:[%s5962_s6 + $0xa0] sm:$0xff]  ;;  %v3877_v20 = vpack.c.bf16 %v3347_v5, %v3345_v4  ;;  %v1527_v5 = vld [vmem:[%s5962_s6 + $0x28] sm:$0xff] }
 0x21b   :  { %3853 = vmatprep.subr.bf16.mxu1 %v4446_v40  ;;  %v3879_v22 = vpack.c.bf16 %v3346_v10, %v3344_v8 }
 0x21c   :  { %3332 = vmatprep.mubr.msk.f32.mxu1 %vm167_vm5, %v1150_v12 }
 0x21d   :  { %1285 = vmatmul.mubr.f32.gmra.mrb[10].mxu1 %v5078_v1 }
 0x21e   :  { %3855 = vmatpush1.bf16.msra.mxu1 %v3854_v15  ;;  %3333 = vmatprep.mubr.msk.f32.mxu1 %vm167_vm5, %v1152_v21  ;;  %v3349_v15 = vld [vmem:[%s5962_s6 + $0xb8] sm:$0xff] }
 0x21f   :  { %3856 = vmatprep.subr.bf16.mxu1 %v4446_v40 }
 0x221   :  { %1290 = vmatmul.mubr.f32.gmra.mrb[12].mxu1 %v1151_v24 }
 0x222   :  { %3858 = vmatpush1.bf16.msra.mxu1 %v3857_v23  ;;  %3334 = vmatprep.mubr.msk.f32.mxu1 %vm167_vm5, %v5022_v9  ;;  %v1314_v9 = vld [vmem:[%s5960_s4 + $0x98] sm:$0xff]  ;;  %v3881_v23 = vpack.c.bf16 %v3351_v19, %v3349_v15  ;;  %v1528_v15 = vld [vmem:[%s5962_s6 + $0x30] sm:$0xff] }
 0x223   :  { %3859 = vmatprep.subr.bf16.mxu1 %v4446_v40  ;;  %v3866_v34 = vpack.c.bf16 %v1314_v9, %v1313_v33  ;;  %v3352_v9 = vld [vmem:[%s5962_s6 + $0xd0] sm:$0xff] }
 0x226   :  { %3861 = vmatpush1.bf16.msra.mxu1 %v3860_v29 }
 0x227   :  { %3862 = vmatprep.subr.bf16.mxu1 %v4446_v40 }
 0x22a   :  { %3864 = vmatpush1.bf16.msra.mxu1 %v3863_v32  ;;  %v3355_v32 = vld [vmem:[%s5962_s6 + $0xe8] sm:$0xff] }
 0x22b   :  { %3865 = vmatprep.subr.bf16.mxu1 %v4446_v40  ;;  %v3885_v33 = vpack.c.bf16 %v3355_v32, %v3353_v31 }
 0x22e   :  { %3867 = vmatpush1.bf16.msra.mxu1 %v3866_v34  ;;  %v3354_v34 = vld [vmem:[%s5962_s6 + $0xe0] sm:$0xff] }
 0x22f   :  { %1356 = vmatprep.subr.mxu1 %v4444_v0 }
 0x232   :  { %1357 = vmatpush1.msra.mxu1 %v1315_v35  ;;  %v3887_v35 = vpack.c.bf16 %v3354_v34, %v3352_v9  ;;  %v1534_v9 = vld [vmem:[%s5962_s6 + $0x60] sm:$0xff]  ;;  %v1536_v34 = vld [vmem:[%s5962_s6 + $0x70] sm:$0xff] }
 0x233   :  { %1381 = vmatmul.mubr.f32.vlgmr.msra.gmra.mrb[14].mxu1 %v5004_v51  ;;  %3868 = vmatprep.subr.bf16.mxu1 %v4446_v40 }
 0x234   :  { %3335 = vmatprep.mubr.msk.f32.mxu1 %vm167_vm5, %v5042_v30 }
 0x237   :  { %1386 = vmatmul.mubr.f32.gmra.mrb[16].mxu1 %v5006_v52 }
 0x238   :  { %3336 = vmatprep.mubr.msk.f32.mxu1 %vm167_vm5, %v5061_v42 }
 0x23b   :  { %1391 = vmatmul.mubr.f32.gmra.mrb[18].mxu1 %v5019_v6 }
 0x23c   :  { %3337 = vmatprep.mubr.msk.f32.mxu1 %vm167_vm5, %v5080_v53 }
 0x23f   :  { %1396 = vmatmul.mubr.f32.gmra.mrb[20].mxu1 %v5037_v27 }
 0x240   :  { %3338 = vmatprep.mubr.msk.f32.mxu1 %vm167_vm5, %v1148_v63 }
 0x243   :  { %1401 = vmatmul.mubr.f32.gmra.mrb[22].mxu1 %v5059_v41 }
 0x244   :  { %3339 = vmatprep.mubr.msk.f32.mxu1 %vm167_vm5, %v1150_v12 }
 0x247   :  { %1406 = vmatmul.mubr.f32.gmra.mrb[24].mxu1 %v5078_v1 }
 0x248   :  { %3340 = vmatprep.mubr.msk.f32.mxu1 %vm167_vm5, %v1152_v21  ;;  %v1423_v21 = vld [vmem:[#allocation11] sm:$0xff] }
 0x24b   :  { %1411 = vmatmul.mubr.f32.gmra.mrb[26].mxu1 %v1151_v24  ;;  %v3348_v24 = vld [vmem:[%s5962_s6 + $0xb0] sm:$0xff] }
 0x24c   :  { %3579 = vmatprep.mubr.msk.f32.mxu1 %vm4447_vm8, %v4444_v0  ;;  %v3883_v29 = vpack.c.bf16 %v3350_v25, %v3348_v24  ;;  %v1530_v24 = vld [vmem:[%s5962_s6 + $0x40] sm:$0xff]  ;;  %v1532_v25 = vld [vmem:[%s5962_s6 + $0x50] sm:$0xff] }
 0x24d   :  { %v3903_v31 = vpack.c.bf16 %v1532_v25, %v1530_v24  ;;  %v3399_v24 = vld [vmem:[%s5962_s6 + $0x200] sm:$0xff] }
 0x2dc   :  { %v1261_v51 = vpop.f32.mrb[0].mxu1 }
 0x2dd   :  { %v1263_v52 = vpop.f32.mrb[1].mxu1 }
 0x2de   :  { %v3359_v52 = vld [vmem:[%s5962_s6 + $0x108] sm:$0xff] }
 0x2e0   :  { %v1266_v6 = vpop.f32.mrb[2].mxu1 }
 0x2e1   :  { %v1268_v27 = vpop.f32.mrb[3].mxu1 }
 0x2e2   :  { %v3356_v27 = vld [vmem:[%s5962_s6 + $0xf0] sm:$0xff] }
 0x2e4   :  { %v1271_v30 = vpop.f32.mrb[4].mxu1 }
 0x2e5   :  { %v1273_v36 = vpop.f32.mrb[5].mxu1 }
 0x2e8   :  { %v1276_v17 = vpop.f32.mrb[6].mxu1 }
 0x2e9   :  { %v1278_v37 = vpop.f32.mrb[7].mxu1 }
 0x2ea   :  { %v3360_v37 = vld [vmem:[%s5962_s6 + $0x110] sm:$0xff] }
 0x2ec   :  { %v1281_v38 = vpop.f32.mrb[8].mxu1 }
 0x2ed   :  { %v1283_v39 = vpop.f32.mrb[9].mxu1 }
 0x2ee   :  { %v1525_v39 = vld [vmem:[%s5962_s6 + $0x18] sm:$0xff] }
 0x2f0   :  { %v1286_v18 = vpop.f32.mrb[10].mxu1 }
 0x2f1   :  { %v1288_v41 = vpop.f32.mrb[11].mxu1 }
 0x2f2   :  { %v2180_v41 = vld [vmem:[%s5964_s8] sm:$0xff] }
 0x2f4   :  { %v1291_v42 = vpop.f32.mrb[12].mxu1 }
 0x2f5   :  { %v1293_v43 = vpop.f32.mrb[13].mxu1 }
 0x2f6   :  { %v2182_v43 = vld [vmem:[%s5964_s8 + $0x10] sm:$0xff] }
 0x306   :  { %v1382_v44 = vpop.f32.mrb[14].mxu1 }
 0x307   :  { %v1416_v45 = vmax.f32 %v1261_v51, %v1382_v44  ;;  %v1384_v46 = vpop.f32.mrb[15].mxu1  ;;  %v3357_v51 = vld [vmem:[%s5962_s6 + $0xf8] sm:$0xff] }
 0x30a   :  { %v1387_v47 = vpop.f32.mrb[16].mxu1 }
 0x30b   :  { %v1417_v48 = vmax.f32 %v1266_v6, %v1387_v47  ;;  %v1389_v49 = vpop.f32.mrb[17].mxu1  ;;  %v3889_v6 = vpack.c.bf16 %v3359_v52, %v3357_v51  ;;  %v2184_v47 = vld [vmem:[%s5964_s8 + $0x20] sm:$0xff]  ;;  %v1539_v51 = vld [vmem:[%s5962_s6 + $0x88] sm:$0xff] }
 0x30c   :  { %v3369_v52 = vld [vmem:[%s5962_s6 + $0x128] sm:$0xff] }
 0x30d   :  { %v3869_v50 = vpack.c.bf16 %v1417_v48, %v1416_v45  ;;  %v2183_v45 = vld [vmem:[%s5964_s8 + $0x18] sm:$0xff]  ;;  %v2185_v48 = vld [vmem:[%s5964_s8 + $0x28] sm:$0xff] }
 0x30e   :  { %v1392_v1 = vpop.f32.mrb[18].mxu1  ;;  %v3961_v46 = vpack.c.bf16 %v2183_v45, %v2182_v43  ;;  %v3964_v49 = vpack.c.bf16 %v2185_v48, %v2184_v47  ;;  %v3379_v45 = vld [vmem:[%s5962_s6 + $0x178] sm:$0xff]  ;;  %v3376_v48 = vld [vmem:[%s5962_s6 + $0x160] sm:$0xff] }
 0x30f   :  { %v1418_v53 = vmax.f32 %v1271_v30, %v1392_v1  ;;  %v1394_v54 = vpop.f32.mrb[19].mxu1  ;;  %3870 = vmatpush3.bf16.msra.mxu1 %v3869_v50  ;;  %v3358_v30 = vld [vmem:[%s5962_s6 + $0x100] sm:$0xff]  ;;  %v2186_v50 = vld [vmem:[%s5964_s8 + $0x30] sm:$0xff]  ;;  %v2187_v1 = vld [vmem:[%s5964_s8 + $0x38] sm:$0xff] }
 0x310   :  { %3871 = vmatprep.subr.bf16.mxu1 %v4446_v40  ;;  %v3891_v36 = vpack.c.bf16 %v3358_v30, %v3356_v27  ;;  %v2188_v54 = vld [vmem:[%s5964_s8 + $0x40] sm:$0xff]  ;;  %v3370_v30 = vld [vmem:[%s5962_s6 + $0x130] sm:$0xff] }
 0x311   :  { %v3368_v27 = vld [vmem:[%s5962_s6 + $0x120] sm:$0xff] }
 0x312   :  { %v1397_v55 = vpop.f32.mrb[20].mxu1 }
 0x313   :  { %v1419_v56 = vmax.f32 %v1276_v17, %v1397_v55  ;;  %v1399_v57 = vpop.f32.mrb[21].mxu1  ;;  %v3361_v17 = vld [vmem:[%s5962_s6 + $0x118] sm:$0xff]  ;;  %v2189_v55 = vld [vmem:[%s5964_s8 + $0x48] sm:$0xff] }
 0x314   :  { %v2190_v57 = vld [vmem:[%s5964_s8 + $0x50] sm:$0xff] }
 0x315   :  { %v3872_v58 = vpack.c.bf16 %v1419_v56, %v1418_v53  ;;  %v3967_v53 = vpack.c.bf16 %v2187_v1, %v2186_v50  ;;  %v3970_v56 = vpack.c.bf16 %v2189_v55, %v2188_v54  ;;  %v3381_v1 = vld [vmem:[%s5962_s6 + $0x188] sm:$0xff] }
 0x316   :  { %v1402_v59 = vpop.f32.mrb[22].mxu1 }
 0x317   :  { %v1420_v60 = vmax.f32 %v1281_v38, %v1402_v59  ;;  %v1404_v61 = vpop.f32.mrb[23].mxu1  ;;  %3873 = vmatpush3.bf16.msra.mxu1 %v3872_v58  ;;  %v1523_v38 = vld [vmem:[%s5962_s6 + $0x8] sm:$0xff]  ;;  %v2191_v58 = vld [vmem:[%s5964_s8 + $0x58] sm:$0xff] }
 0x318   :  { %3874 = vmatprep.subr.bf16.mxu1 %v4446_v40  ;;  %v3973_v59 = vpack.c.bf16 %v2191_v58, %v2190_v57  ;;  %v3382_v57 = vld [vmem:[%s5962_s6 + $0x190] sm:$0xff] }
 0x31a   :  { %v1407_v62 = vpop.f32.mrb[24].mxu1 }
 0x31b   :  { %v1421_v63 = vmax.f32 %v1286_v18, %v1407_v62  ;;  %v1409_v2 = vpop.f32.mrb[25].mxu1  ;;  %v3893_v18 = vpack.c.bf16 %v1525_v39, %v1523_v38  ;;  %v3911_v39 = vpack.c.bf16 %v3370_v30, %v3368_v27  ;;  %v3412_v27 = vld [vmem:[%s5962_s6 + $0x250] sm:$0xff]  ;;  %v3415_v30 = vld [vmem:[%s5962_s6 + $0x268] sm:$0xff] }
 0x31c   :  { %v1522_v2 = vld [vmem:[%s5962_s6] sm:$0xff] }
 0x31d   :  { %v3875_v3 = vpack.c.bf16 %v1421_v63, %v1420_v60 }
 0x31e   :  { %v1412_v7 = vpop.f32.mrb[26].mxu1 }
 0x31f   :  { %v1422_v11 = vmax.f32 %v1291_v42, %v1412_v7  ;;  %v1414_v12 = vpop.f32.mrb[27].mxu1  ;;  %3876 = vmatpush3.bf16.msra.mxu1 %v3875_v3  ;;  %v2181_v42 = vld [vmem:[%s5964_s8 + $0x8] sm:$0xff]  ;;  %v1524_v3 = vld [vmem:[%s5962_s6 + $0x10] sm:$0xff]  ;;  %v1529_v7 = vld [vmem:[%s5962_s6 + $0x38] sm:$0xff] }
 0x320   :  { %3577 = vmatprep.subr.mxu1 %v4444_v0  ;;  %v3958_v44 = vpack.c.bf16 %v2181_v42, %v2180_v41  ;;  %v3895_v10 = vpack.c.bf16 %v1524_v3, %v1522_v2  ;;  %v1526_v12 = vld [vmem:[%s5962_s6 + $0x20] sm:$0xff]  ;;  %v3374_v42 = vld [vmem:[%s5962_s6 + $0x150] sm:$0xff]  ;;  %v3394_v3 = vld [vmem:[%s5962_s6 + $0x1d8] sm:$0xff] }
 0x321   :  { %v3372_v41 = vld [vmem:[%s5962_s6 + $0x140] sm:$0xff] }
 0x322   :  { %3959 = vmatpush1.bf16.msra.mxu0 %v3958_v44  ;;  %v3377_v44 = vld [vmem:[%s5962_s6 + $0x168] sm:$0xff]  ;;  %v3391_v2 = vld [vmem:[%s5962_s6 + $0x1c0] sm:$0xff] }
 0x323   :  { %3578 = vmatpush3.msra.mxu1 %v1422_v11  ;;  %3960 = vmatprep.subr.bf16.mxu0 %v4446_v40  ;;  %v3897_v11 = vpack.c.bf16 %v1529_v7, %v1527_v5  ;;  %v3917_v47 = vpack.c.bf16 %v3379_v45, %v3377_v44  ;;  %v3384_v5 = vld [vmem:[%s5962_s6 + $0x1a0] sm:$0xff]  ;;  %v3421_v44 = vld [vmem:[%s5962_s6 + $0x298] sm:$0xff] }
 0x324   :  { %3580 = vmatmul.mubr.msk.f32.vlgmr.msra.gmra.mrb[28].mxu1 %vm1426_vm10, %v1423_v21  ;;  %3878 = vmatprep.subr.bf16.mxu1 %v3877_v20  ;;  %v1531_v20 = vld [vmem:[%s5962_s6 + $0x48] sm:$0xff]  ;;  %v1533_v21 = vld [vmem:[%s5962_s6 + $0x58] sm:$0xff] }
 0x325   :  { %3582 = vmatprep.mubr.msk.f32.mxu1 %vm4447_vm8, %v4444_v0  ;;  %3880 = vmatpush1.bf16.msra.mxu1 %v3879_v22  ;;  %v3899_v22 = vpack.c.bf16 %v1528_v15, %v1526_v12  ;;  %v3395_v12 = vld [vmem:[%s5962_s6 + $0x1e0] sm:$0xff] }
 0x326   :  { %3882 = vmatprep.subr.bf16.mxu1 %v3881_v23  ;;  %3962 = vmatpush1.bf16.msra.mxu0 %v3961_v46  ;;  %v3901_v23 = vpack.c.bf16 %v1533_v21, %v1531_v20  ;;  %v3915_v46 = vpack.c.bf16 %v3374_v42, %v3372_v41  ;;  %v3400_v20 = vld [vmem:[%s5962_s6 + $0x208] sm:$0xff]  ;;  %v3416_v41 = vld [vmem:[%s5962_s6 + $0x270] sm:$0xff] }
 0x327   :  { %3963 = vmatprep.subr.bf16.mxu0 %v4446_v40 }
 0x328   :  { %3583 = vmatmul.mubr.msk.f32.gmra.mrb[30].mxu1 %vm1426_vm10, %v1424_v26 }
 0x329   :  { %3585 = vmatprep.mubr.msk.f32.mxu1 %vm4447_vm8, %v4444_v0  ;;  %3884 = vmatpush1.bf16.msra.mxu1 %v3883_v29  ;;  %v1535_v29 = vld [vmem:[%s5962_s6 + $0x68] sm:$0xff] }
 0x32a   :  { %3886 = vmatprep.subr.bf16.mxu1 %v3885_v33  ;;  %3965 = vmatpush1.bf16.msra.mxu0 %v3964_v49  ;;  %v3378_v49 = vld [vmem:[%s5962_s6 + $0x170] sm:$0xff] }
 0x32b   :  { %3966 = vmatprep.subr.bf16.mxu0 %v4446_v40  ;;  %v3919_v54 = vpack.c.bf16 %v3378_v49, %v3376_v48  ;;  %v3420_v48 = vld [vmem:[%s5962_s6 + $0x290] sm:$0xff] }
 0x32c   :  { %3586 = vmatmul.mubr.msk.f32.gmra.mrb[32].mxu1 %vm1426_vm10, %v1425_v28  ;;  %v1537_v28 = vld [vmem:[%s5962_s6 + $0x78] sm:$0xff] }
 0x32d   :  { %1635 = vmatprep.mubr.f32.mxu1 %v4444_v0  ;;  %3888 = vmatpush1.bf16.msra.mxu1 %v3887_v35  ;;  %v3905_v33 = vpack.c.bf16 %v1537_v28, %v1535_v29  ;;  %v3907_v35 = vpack.c.bf16 %v1536_v34, %v1534_v9  ;;  %v3404_v29 = vld [vmem:[%s5962_s6 + $0x228] sm:$0xff] }
 0x32e   :  { %3890 = vmatprep.subr.bf16.mxu1 %v3889_v6  ;;  %3968 = vmatpush1.bf16.msra.mxu0 %v3967_v53  ;;  %v3371_v6 = vld [vmem:[%s5962_s6 + $0x138] sm:$0xff] }
 0x32f   :  { %3969 = vmatprep.subr.bf16.mxu0 %v4446_v40  ;;  %v3909_v38 = vpack.c.bf16 %v3371_v6, %v3369_v52  ;;  %v3383_v53 = vld [vmem:[%s5962_s6 + $0x198] sm:$0xff]  ;;  %v3410_v6 = vld [vmem:[%s5962_s6 + $0x240] sm:$0xff] }
 0x330   :  { %v3921_v55 = vpack.c.bf16 %v3383_v53, %v3381_v1  ;;  %v3413_v52 = vld [vmem:[%s5962_s6 + $0x258] sm:$0xff] }
 0x331   :  { %3892 = vmatpush1.bf16.msra.mxu1 %v3891_v36  ;;  %v3373_v36 = vld [vmem:[%s5962_s6 + $0x148] sm:$0xff]  ;;  %v3425_v1 = vld [vmem:[%s5962_s6 + $0x2b8] sm:$0xff] }
 0x332   :  { %1587 = vmatprep.subr.mxu1 %v3361_v17  ;;  %3971 = vmatpush1.bf16.msra.mxu0 %v3970_v56  ;;  %v3375_v17 = vld [vmem:[%s5962_s6 + $0x158] sm:$0xff]  ;;  %v3380_v56 = vld [vmem:[%s5962_s6 + $0x180] sm:$0xff] }
 0x333   :  { %3972 = vmatprep.subr.bf16.mxu0 %v4446_v40 }
 0x335   :  { %1588 = vmatpush1.msra.mxu1 %v3360_v37  ;;  %v1538_v37 = vld [vmem:[%s5962_s6 + $0x80] sm:$0xff] }
 0x336   :  { %3894 = vmatprep.subr.bf16.mxu1 %v3893_v18  ;;  %3974 = vmatpush1.bf16.msra.mxu0 %v3973_v59  ;;  %v3913_v18 = vpack.c.bf16 %v3375_v17, %v3373_v36  ;;  %v3923_v59 = vpack.c.bf16 %v3382_v57, %v3380_v56  ;;  %v3417_v36 = vld [vmem:[%s5962_s6 + $0x278] sm:$0xff]  ;;  %v3405_v17 = vld [vmem:[%s5962_s6 + $0x230] sm:$0xff] }
 0x337   :  { %3975 = vmatprep.subr.bf16.mxu0 %v4446_v40  ;;  %v3424_v56 = vld [vmem:[%s5962_s6 + $0x2b0] sm:$0xff] }
 0x3f7   :  { %v1502_v60 = vpop.f32.mrb[28].mxu1 }
 0x3f8   :  { %1516 = vst.msk [vmem:[#allocation4] sm:$0xff] %vm184_vm9, %v1502_v60  ;;  %v3581_v61 = vpop.f32.mrb[29].mxu1  ;;  %v3385_v60 = vld [vmem:[%s5962_s6 + $0x1a8] sm:$0xff] }
 0x3f9   :  { %v3390_v61 = vld [vmem:[%s5962_s6 + $0x1b8] sm:$0xff] }
 0x3fb   :  { %v1507_v62 = vpop.f32.mrb[30].mxu1 }
 0x3fc   :  { %1517 = vst.msk [vmem:[#allocation4 + $0x8] sm:$0xff] %vm184_vm9, %v1507_v62  ;;  %v3584_v63 = vpop.f32.mrb[31].mxu1  ;;  %v3392_v62 = vld [vmem:[%s5962_s6 + $0x1c8] sm:$0xff] }
 0x3fd   :  { %v3389_v63 = vld [vmem:[%s5962_s6 + $0x1b0] sm:$0xff]  ;;  %v3925_v7 = vpack.c.bf16 %v3392_v62, %v3390_v61 }
 0x3ff   :  { %v1512_v4 = vpop.f32.mrb[32].mxu1  ;;  %v1519_v43 = vld [vmem:[#allocation4] sm:$0xff] }
 0x400   :  { %1518 = vst.msk [vmem:[#allocation4 + $0x10] sm:$0xff] %vm184_vm9, %v1512_v4  ;;  %v3587_v8 = vpop.f32.mrb[33].mxu1  ;;  %v3396_v4 = vld [vmem:[%s5962_s6 + $0x1e8] sm:$0xff] }
 0x401   :  { %v3927_v8 = vpack.c.bf16 %v3391_v2, %v3389_v63  ;;  %v2192_v2 = vld [vmem:[%s5964_s8 + $0x60] sm:$0xff] }
 0x403   :  { %v1540_v19 = vld [vmem:[#allocation4 + $0x1] sm:$0xff] }
 0x404   :  { %3362 = vmatmul.mubr.msk.f32.vlgmr.msra.gmra.mrb[34].mxu1 %vm184_vm9, %v1540_v19  ;;  %v1520_v50 = vld [vmem:[#allocation4 + $0x8] sm:$0xff]  ;;  %v3398_v19 = vld [vmem:[%s5962_s6 + $0x1f8] sm:$0xff] }
 0x405   :  { %3896 = vmatpush1.bf16.msra.mxu1 %v3895_v10  ;;  %1641 = vmatprep.mubr.f32.mxu1 %v4444_v0  ;;  %v3929_v10 = vpack.c.bf16 %v3396_v4, %v3394_v3  ;;  %v1746_v15 = vld [vmem:[#allocation4 + $0x2] sm:$0xff] }
 0x406   :  { %3898 = vmatprep.subr.bf16.mxu1 %v3897_v11  ;;  %v3393_v11 = vld [vmem:[%s5962_s6 + $0x1d0] sm:$0xff]  ;;  %v1866_v42 = vld [vmem:[#allocation4 + $0x3] sm:$0xff] }
 0x407   :  { %v1541_v26 = vld [vmem:[#allocation4 + $0x9] sm:$0xff]  ;;  %v1542_v32 = vld [vmem:[#allocation4 + $0x11] sm:$0xff]  ;;  %v3931_v21 = vpack.c.bf16 %v3395_v12, %v3393_v11 }
 0x408   :  { %3363 = vmatmul.mubr.msk.f32.gmra.mrb[36].mxu1 %vm184_vm9, %v1541_v26  ;;  %v1521_v58 = vld [vmem:[#allocation4 + $0x10] sm:$0xff]  ;;  %v3402_v26 = vld [vmem:[%s5962_s6 + $0x218] sm:$0xff]  ;;  %v1986_v61 = vld [vmem:[#allocation4 + $0x4] sm:$0xff] }
 0x409   :  { %3900 = vmatpush1.bf16.msra.mxu1 %v3899_v22  ;;  %1647 = vmatprep.mubr.f32.mxu1 %v4444_v0  ;;  %v3933_v22 = vpack.c.bf16 %v3400_v20, %v3398_v19  ;;  %v1747_v25 = vld [vmem:[#allocation4 + $0xa] sm:$0xff]  ;;  %v1748_v9 = vld [vmem:[#allocation4 + $0x12] sm:$0xff] }
 0x40a   :  { %3902 = vmatprep.subr.bf16.mxu1 %v3901_v23  ;;  %v3397_v23 = vld [vmem:[%s5962_s6 + $0x1f0] sm:$0xff]  ;;  %v2193_v3 = vld [vmem:[%s5964_s8 + $0x68] sm:$0xff]  ;;  %v2199_v19 = vld [vmem:[%s5964_s8 + $0x98] sm:$0xff] }
 0x40b   :  { %v3935_v28 = vpack.c.bf16 %v3399_v24, %v3397_v23  ;;  %v1867_v49 = vld [vmem:[#allocation4 + $0xb] sm:$0xff]  ;;  %v1868_v57 = vld [vmem:[#allocation4 + $0x13] sm:$0xff]  ;;  %v3976_v4 = vpack.c.bf16 %v2193_v3, %v2192_v2 }
 0x40c   :  { %3364 = vmatmul.mubr.msk.f32.gmra.mrb[38].mxu1 %vm184_vm9, %v1542_v32  ;;  %v3401_v32 = vld [vmem:[%s5962_s6 + $0x210] sm:$0xff]  ;;  %v2197_v11 = vld [vmem:[%s5964_s8 + $0x88] sm:$0xff]  ;;  %v2296_v3 = vld [vmem:[%s5965_s9 + $0x18] sm:$0xff] }
 0x40d   :  { %3904 = vmatpush1.bf16.msra.mxu1 %v3903_v31  ;;  %1727 = vmatprep.mubr.f32.mxu1 %v4444_v0  ;;  %v3937_v31 = vpack.c.bf16 %v3404_v29, %v3402_v26  ;;  %v1987_v62 = vld [vmem:[#allocation4 + $0xc] sm:$0xff]  ;;  %v1988_v63 = vld [vmem:[#allocation4 + $0x14] sm:$0xff] }
 0x40e   :  { %3906 = vmatprep.subr.bf16.mxu1 %v3905_v33  ;;  %v3403_v33 = vld [vmem:[%s5962_s6 + $0x220] sm:$0xff]  ;;  %3977 = vmatpush1.bf16.msra.mxu0 %v3976_v4  ;;  %v2202_v23 = vld [vmem:[%s5964_s8 + $0xb0] sm:$0xff] }
 0x40f   :  { %v3939_v34 = vpack.c.bf16 %v3403_v33, %v3401_v32  ;;  %3978 = vmatprep.subr.bf16.mxu0 %v4446_v40  ;;  %v2106_v29 = vld [vmem:[#allocation12] sm:$0x3] }
 0x410   :  { %v2295_v2 = vld [vmem:[%s5965_s9 + $0x10] sm:$0xff] }
 0x411   :  { %3908 = vmatpush1.bf16.msra.mxu1 %v3907_v35  ;;  %v3406_v35 = vld [vmem:[%s5962_s6 + $0x238] sm:$0xff] }
 0x412   :  { %1679 = vmatprep.subr.mxu1 %v1539_v51  ;;  %v3411_v51 = vld [vmem:[%s5962_s6 + $0x248] sm:$0xff] }
 0x415   :  { %1680 = vmatpush1.msra.mxu1 %v1538_v37  ;;  %v3941_v37 = vpack.c.bf16 %v3413_v52, %v3411_v51 }
 0x416   :  { %3365 = vmatmul.mubr.msk.f32.vlgmr.msra.gmra.mrb[34].mxu1 %vm184_vm9, %v1519_v43  ;;  %3910 = vmatprep.subr.bf16.mxu1 %v3909_v38  ;;  %v3943_v38 = vpack.c.bf16 %v3412_v27, %v3410_v6  ;;  %v3419_v43 = vld [vmem:[%s5962_s6 + $0x288] sm:$0xff] }
 0x417   :  { %3912 = vmatpush1.bf16.msra.mxu1 %v3911_v39  ;;  %1733 = vmatprep.mubr.f32.mxu1 %v4444_v0  ;;  %v3945_v39 = vpack.c.bf16 %v3417_v36, %v3415_v30 }
 0x418   :  { %3914 = vmatprep.subr.bf16.mxu1 %v3913_v18  ;;  %v3414_v18 = vld [vmem:[%s5962_s6 + $0x260] sm:$0xff] }
 0x419   :  { %v3947_v45 = vpack.c.bf16 %v3416_v41, %v3414_v18 }
 0x41a   :  { %3366 = vmatmul.mubr.msk.f32.gmra.mrb[36].mxu1 %vm184_vm9, %v1520_v50  ;;  %v3423_v50 = vld [vmem:[%s5962_s6 + $0x2a8] sm:$0xff] }
 0x41b   :  { %3916 = vmatpush1.bf16.msra.mxu1 %v3915_v46  ;;  %1739 = vmatprep.mubr.f32.mxu1 %v4444_v0  ;;  %v3949_v46 = vpack.c.bf16 %v3421_v44, %v3419_v43 }
 0x41c   :  { %3918 = vmatprep.subr.bf16.mxu1 %v3917_v47  ;;  %v3418_v47 = vld [vmem:[%s5962_s6 + $0x280] sm:$0xff] }
 0x41d   :  { %v3951_v53 = vpack.c.bf16 %v3420_v48, %v3418_v47 }
 0x41e   :  { %3367 = vmatmul.mubr.msk.f32.gmra.mrb[38].mxu1 %vm184_vm9, %v1521_v58 }
 0x41f   :  { %3920 = vmatpush1.bf16.msra.mxu1 %v3919_v54  ;;  %1841 = vmatprep.mubr.f32.mxu1 %v4444_v0  ;;  %v3953_v54 = vpack.c.bf16 %v3425_v1, %v3423_v50  ;;  %v2145_v50 = vld [vmem:[#allocation5 + $0x38] sm:$0x1] }
 0x420   :  { %3922 = vmatprep.subr.bf16.mxu1 %v3921_v55  ;;  %v3422_v55 = vld [vmem:[%s5962_s6 + $0x2a0] sm:$0xff] }
 0x421   :  { %v3955_v58 = vpack.c.bf16 %v3424_v56, %v3422_v55  ;;  %v2294_v55 = vld [vmem:[%s5965_s9 + $0x8] sm:$0xff] }
 0x423   :  { %3924 = vmatpush1.bf16.msra.mxu1 %v3923_v59  ;;  %v3427_v59 = vld [vmem:[%s5962_s6 + $0x2c8] sm:$0xff] }
 0x424   :  { %1793 = vmatprep.subr.mxu1 %v3385_v60  ;;  %v3426_v60 = vld [vmem:[%s5962_s6 + $0x2c0] sm:$0xff] }
 0x427   :  { %1794 = vmatpush1.msra.mxu1 %v3384_v5  ;;  %v2194_v5 = vld [vmem:[%s5964_s8 + $0x70] sm:$0xff] }
 0x428   :  { %3386 = vmatmul.mubr.msk.f32.vlgmr.msra.gmra.mrb[34].mxu1 %vm184_vm9, %v1746_v15  ;;  %3926 = vmatprep.subr.bf16.mxu1 %v3925_v7  ;;  %v2195_v7 = vld [vmem:[%s5964_s8 + $0x78] sm:$0xff]  ;;  %v2198_v15 = vld [vmem:[%s5964_s8 + $0x90] sm:$0xff] }
 0x429   :  { %3928 = vmatpush1.bf16.msra.mxu1 %v3927_v8  ;;  %1847 = vmatprep.mubr.f32.mxu1 %v4444_v0  ;;  %v3979_v8 = vpack.c.bf16 %v2195_v7, %v2194_v5  ;;  %v3985_v20 = vpack.c.bf16 %v2199_v19, %v2198_v15 }
 0x42a   :  { %3930 = vmatprep.subr.bf16.mxu1 %v3929_v10  ;;  %v2196_v10 = vld [vmem:[%s5964_s8 + $0x80] sm:$0xff] }
 0x42b   :  { %3980 = vmatpush1.bf16.msra.mxu0 %v3979_v8  ;;  %v3982_v12 = vpack.c.bf16 %v2197_v11, %v2196_v10  ;;  %v3997_v10 = vpack.c.bf16 %v2296_v3, %v2295_v2  ;;  %v2297_v11 = vld [vmem:[%s5965_s9 + $0x20] sm:$0xff] }
 0x42c   :  { %3387 = vmatmul.mubr.msk.f32.gmra.mrb[36].mxu1 %vm184_vm9, %v1747_v25  ;;  %3981 = vmatprep.subr.bf16.mxu0 %v4446_v40  ;;  %v2203_v25 = vld [vmem:[%s5964_s8 + $0xb8] sm:$0xff] }
 0x42d   :  { %3932 = vmatpush1.bf16.msra.mxu1 %v3931_v21  ;;  %1853 = vmatprep.mubr.f32.mxu1 %v4444_v0  ;;  %v2200_v21 = vld [vmem:[%s5964_s8 + $0xa0] sm:$0xff]  ;;  %v3991_v26 = vpack.c.bf16 %v2203_v25, %v2202_v23  ;;  %v2300_v23 = vld [vmem:[%s5965_s9 + $0x38] sm:$0xff] }
 0x42e   :  { %3934 = vmatprep.subr.bf16.mxu1 %v3933_v22  ;;  %v2201_v22 = vld [vmem:[%s5964_s8 + $0xa8] sm:$0xff]  ;;  %v2301_v25 = vld [vmem:[%s5965_s9 + $0x40] sm:$0xff]  ;;  %s4448_s8 = smov [#allocation20]  }
 0x42f   :  { %3983 = vmatpush1.bf16.msra.mxu0 %v3982_v12  ;;  %v3988_v24 = vpack.c.bf16 %v2201_v22, %v2200_v21  ;;  %v2298_v12 = vld [vmem:[%s5965_s9 + $0x28] sm:$0xff]  ;;  %v2299_v22 = vld [vmem:[%s5965_s9 + $0x30] sm:$0xff]  ;;  %s3237_s24 = sshll.u32 %s4448_s8, 4  ;;  %s3238_s24 = int_to_ptr.vmem [resolvable:$true] %s3237_s24 }
 0x430   :  { %3388 = vmatmul.mubr.msk.f32.gmra.mrb[38].mxu1 %vm184_vm9, %v1748_v9  ;;  %3984 = vmatprep.subr.bf16.mxu0 %v4446_v40  ;;  %s4398_s6 = scalar_lea.vmem %s3238_s24, 32  ;;  %p4403_p9 = scmp.lt.s32.totalorder %s3238_s24, %s3238_s24 }
 0x431   :  { %3936 = vmatpush1.bf16.msra.mxu1 %v3935_v28  ;;  %1961 = vmatprep.mubr.f32.mxu1 %v4444_v0  ;;  %v2111_v28 = vrot.slane %v2106_v29, %v1010_v14  ;;  %p4399_p8 = scmp.ne.s32.totalorder %s3238_s24, %s4398_s6  ;;  %p4404_p10 = scmp.lt.s32.totalorder %s4398_s6, %s4398_s6 }
 0x432   :  { %3938 = vmatprep.subr.bf16.mxu1 %v3937_v31  ;;  %v2115_v31 = vrot.slane %v2106_v29, %v1014_v16 }
 0x433   :  { %3986 = vmatpush1.bf16.msra.mxu0 %v3985_v20  ;;  %v4000_v20 = vpack.c.bf16 %v2298_v12, %v2297_v11  ;;  %v2475_v11 = vld [vmem:[%s5967_s11] sm:$0xff]  ;;  %v2476_v12 = vld [vmem:[%s5967_s11 + $0x8] sm:$0xff]  ;;  %p4405_p11 = por %p4404_p10, %p4403_p9 }
 0x434   :  { %3987 = vmatprep.subr.bf16.mxu0 %v4446_v40 }
 0x435   :  { %3940 = vmatpush1.bf16.msra.mxu1 %v3939_v34  ;;  %p4406_p12 = pnand %p4405_p11, %p4399_p8 }
 0x436   :  { %1913 = vmatprep.subr.mxu1 %v3406_v35 }
 0x437   :  { %3989 = vmatpush1.bf16.msra.mxu0 %v3988_v24  ;;  %v4003_v24 = vpack.c.bf16 %v2300_v23, %v2299_v22  ;;  %v2479_v23 = vld [vmem:[%s5967_s11 + $0x20] sm:$0xff] }
 0x438   :  { %3990 = vmatprep.subr.bf16.mxu0 %v4446_v40 }
 0x439   :  { %1914 = vmatpush1.msra.mxu1 %v3405_v17 }
 0x43a   :  { %3407 = vmatmul.mubr.msk.f32.vlgmr.msra.gmra.mrb[34].mxu1 %vm184_vm9, %v1866_v42  ;;  %3942 = vmatprep.subr.bf16.mxu1 %v3941_v37 }
 0x43b   :  { %3944 = vmatpush1.bf16.msra.mxu1 %v3943_v38  ;;  %1967 = vmatprep.mubr.f32.mxu1 %v4444_v0 }
 0x43c   :  { %3946 = vmatprep.subr.bf16.mxu1 %v3945_v39  ;;  %3992 = vmatpush1.bf16.msra.mxu0 %v3991_v26  ;;  %v2302_v26 = vld [vmem:[%s5965_s9 + $0x48] sm:$0xff] }
 0x43d   :  { %3993 = vmatprep.subr.bf16.mxu0 %v4446_v40  ;;  %v4006_v29 = vpack.c.bf16 %v2302_v26, %v2301_v25  ;;  %v2481_v26 = vld [vmem:[%s5967_s11 + $0x30] sm:$0xff] }
 0x43e   :  { %3408 = vmatmul.mubr.msk.f32.gmra.mrb[36].mxu1 %vm184_vm9, %v1867_v49 }
 0x43f   :  { %3948 = vmatpush1.bf16.msra.mxu1 %v3947_v45  ;;  %1973 = vmatprep.mubr.f32.mxu1 %v4444_v0 }
 0x440   :  { %3950 = vmatprep.subr.bf16.mxu1 %v3949_v46 }
 0x442   :  { %3409 = vmatmul.mubr.msk.f32.gmra.mrb[38].mxu1 %vm184_vm9, %v1868_v57 }
 0x443   :  { %3952 = vmatpush1.bf16.msra.mxu1 %v3951_v53  ;;  %2081 = vmatprep.mubr.f32.mxu1 %v4444_v0 }
 0x444   :  { %3954 = vmatprep.subr.bf16.mxu1 %v3953_v54  ;;  %v2293_v54 = vld [vmem:[%s5965_s9] sm:$0xff] }
 0x447   :  { %3956 = vmatpush1.bf16.msra.mxu1 %v3955_v58  ;;  %v2166_v58 = vrot.slane %v2145_v50, 1  ;;  %v3445_v50 = vld [vmem:[%s5967_s11 + $0x70] sm:$0xff] }
 0x448   :  { %2033 = vmatprep.subr.mxu1 %v3427_v59  ;;  %v2144_v59 = vld [vmem:[#allocation5 + $0x30] sm:$0x1] }
 0x449   :  { %v2164_v4 = vrot.slane %v2144_v59, 1 }
 0x44b   :  { %2034 = vmatpush1.msra.mxu1 %v3426_v60 }
 0x44c   :  { %3428 = vmatmul.mubr.msk.f32.vlgmr.msra.gmra.mrb[34].mxu1 %vm184_vm9, %v1986_v61  ;;  %4029 = vmatprep.subr.bf16.mxu1 %v4446_v40  ;;  %v3994_v61 = vpack.c.bf16 %v2294_v55, %v2293_v54 }
 0x44d   :  { %2087 = vmatprep.mubr.f32.mxu1 %v4444_v0 }
 0x450   :  { %3429 = vmatmul.mubr.msk.f32.gmra.mrb[36].mxu1 %vm184_vm9, %v1987_v62 }
 0x451   :  { %2093 = vmatprep.mubr.f32.mxu1 %v4444_v0 }
 0x454   :  { %3430 = vmatmul.mubr.msk.f32.gmra.mrb[38].mxu1 %vm184_vm9, %v1988_v63 }
 0x455   :  { %3594 = vmatprep.mubr.msk.f32.mxu1 %vm4447_vm8, %v4444_v0 }
 0x51f   :  { %v2083_v32 = vpop.f32.mrb[34].mxu1 }
 0x520   :  { %v2118_v33 = vadd.f32 %v2111_v28, %v2083_v32  ;;  %v2085_v9 = vpop.f32.mrb[35].mxu1 }
 0x521   :  { %v2119_v34 = vadd.f32 %v2115_v31, %v2085_v9  ;;  %v2306_v9 = vld [vmem:[%s5965_s9 + $0x68] sm:$0xff] }
 0x522   :  { %v2124_v35 = vmax.f32 %v2118_v33, 0.0  ;;  %v2305_v33 = vld [vmem:[%s5965_s9 + $0x60] sm:$0xff] }
 0x523   :  { %v2125_v51 = vmax.f32 %v2119_v34, 0.0  ;;  %v2089_v52 = vpop.f32.mrb[36].mxu1  ;;  %v4012_v34 = vpack.c.bf16 %v2306_v9, %v2305_v33  ;;  %v3452_v9 = vld [vmem:[%s5967_s11 + $0x90] sm:$0xff] }
 0x524   :  { %2130 = vst [vmem:[#allocation5] sm:$0xff] %v2124_v35  ;;  %v2120_v6 = vadd.f32 %v2111_v28, %v2089_v52  ;;  %v2091_v27 = vpop.f32.mrb[37].mxu1 }
 0x525   :  { %2131 = vst.msk [vmem:[#allocation5 + $0x8] sm:$0xff] %vm191_vm12, %v2125_v51  ;;  %v2121_v30 = vadd.f32 %v2115_v31, %v2091_v27  ;;  %v2308_v51 = vld [vmem:[%s5965_s9 + $0x78] sm:$0xff]  ;;  %v2310_v27 = vld [vmem:[%s5965_s9 + $0x88] sm:$0xff] }
 0x526   :  { %v2126_v36 = vmax.f32 %v2120_v6, 0.0  ;;  %v2309_v6 = vld [vmem:[%s5965_s9 + $0x80] sm:$0xff] }
 0x527   :  { %v2127_v17 = vmax.f32 %v2121_v30, 0.0  ;;  %v2095_v37 = vpop.f32.mrb[38].mxu1  ;;  %v4018_v30 = vpack.c.bf16 %v2310_v27, %v2309_v6  ;;  %v3454_v6 = vld [vmem:[%s5967_s11 + $0xa0] sm:$0xff]  ;;  %v3455_v27 = vld [vmem:[%s5967_s11 + $0xa8] sm:$0xff] }
 0x528   :  { %v2122_v14 = vadd.f32 %v2111_v28, %v2095_v37  ;;  %v2097_v38 = vpop.f32.mrb[39].mxu1  ;;  %v2155_v42 = vrot.slane %v2126_v36, 1  ;;  %v2303_v28 = vld [vmem:[%s5965_s9 + $0x50] sm:$0xff] }
 0x529   :  { %2133 = vst.msk [vmem:[#allocation5 + $0x18] sm:$0xff] %vm191_vm12, %v2127_v17  ;;  %v2123_v13 = vadd.f32 %v2115_v31, %v2097_v38  ;;  %v2304_v31 = vld [vmem:[%s5965_s9 + $0x58] sm:$0xff]  ;;  %v2314_v38 = vld [vmem:[%s5965_s9 + $0xa8] sm:$0xff] }
 0x52a   :  { %v2128_v16 = vmax.f32 %v2122_v14, 0.0  ;;  %v4009_v32 = vpack.c.bf16 %v2304_v31, %v2303_v28  ;;  %v2312_v17 = vld [vmem:[%s5965_s9 + $0x98] sm:$0xff]  ;;  %v2313_v14 = vld [vmem:[%s5965_s9 + $0xa0] sm:$0xff] }
 0x52b   :  { %v2129_v39 = vmax.f32 %v2123_v13, 0.0  ;;  %v2142_v18 = vld [vmem:[#allocation5] sm:$0xfe]  ;;  %v4024_v13 = vpack.c.bf16 %v2314_v38, %v2313_v14  ;;  %v3461_v38 = vld [vmem:[%s5967_s11 + $0xc8] sm:$0xff] }
 0x52c   :  { %v2154_v41 = vrot.slane %v2142_v18, 1  ;;  %v2160_v43 = vrot.slane %v2128_v16, 1  ;;  %v2143_v44 = vld [vmem:[#allocation5 + $0x8] sm:$0xfe]  ;;  %v3450_v31 = vld [vmem:[%s5967_s11 + $0x80] sm:$0xff] }
 0x52d   :  { %2135 = vst.msk [vmem:[#allocation5 + $0x28] sm:$0xff] %vm191_vm12, %v2129_v39  ;;  %v2157_v1 = vrot.slane %v2143_v44, 1  ;;  %v2137_v56 = vld [vmem:[#allocation5 + $0x8] sm:$0xff]  ;;  %v2316_v39 = vld [vmem:[%s5965_s9 + $0xb8] sm:$0xff]  ;;  %v3441_v44 = vld [vmem:[%s5967_s11 + $0x50] sm:$0xff] }
 0x52e   :  { %v2156_v45 = vsel %vm1094_vm7, %v2154_v41, %v2155_v42  ;;  %v2161_v46 = vsel %vm1094_vm7, %v2155_v42, %v2160_v43  ;;  %v2165_v19 = vsel %vm1094_vm7, %v2160_v43, %v2164_v4  ;;  %v3439_v41 = vld [vmem:[%s5967_s11 + $0x40] sm:$0xff]  ;;  %v3440_v42 = vld [vmem:[%s5967_s11 + $0x48] sm:$0xff] }
 0x52f   :  { %v5586_v47 = vmax.f32 %v2124_v35, %v2156_v45  ;;  %v5588_v48 = vmax.f32 %v2126_v36, %v2161_v46  ;;  %v2178_v21 = vmax.f32 %v2128_v16, %v2165_v19  ;;  %v2307_v35 = vld [vmem:[%s5965_s9 + $0x70] sm:$0xff]  ;;  %v4036_v43 = vpack.c.bf16 %v3440_v42, %v3439_v41  ;;  %v3442_v45 = vld [vmem:[%s5967_s11 + $0x58] sm:$0xff]  ;;  %v3460_v14 = vld [vmem:[%s5967_s11 + $0xc0] sm:$0xff] }
 0x530   :  { %v2139_v49 = vld [vmem:[#allocation5 + $0x18] sm:$0xff]  ;;  %v4015_v52 = vpack.c.bf16 %v2308_v51, %v2307_v35  ;;  %v2311_v36 = vld [vmem:[%s5965_s9 + $0x90] sm:$0xff]  ;;  %v4039_v46 = vpack.c.bf16 %v3442_v45, %v3441_v44  ;;  %v4048_v19 = vpack.c.bf16 %v2476_v12, %v2475_v11  ;;  %v3464_v45 = vld [vmem:[%s5967_s11 + $0xe0] sm:$0xff] }
 0x531   :  { %v2158_v53 = vrot.slane %v2139_v49, 1  ;;  %v4021_v37 = vpack.c.bf16 %v2312_v17, %v2311_v36  ;;  %v2315_v16 = vld [vmem:[%s5965_s9 + $0xb0] sm:$0xff]  ;;  %v4069_v36 = vpack.c.bf16 %v3455_v27, %v3454_v6  ;;  %v3045_v11 = vld [vmem:[%s5969_s13 + $0x38] sm:$0xff] }
 0x532   :  { %v4027_v18 = vpack.c.bf16 %v2316_v39, %v2315_v16  ;;  %v4078_v16 = vpack.c.bf16 %v3461_v38, %v3460_v14  ;;  %v3462_v39 = vld [vmem:[%s5967_s11 + $0xd0] sm:$0xff]  ;;  %v3142_v27 = vld [vmem:[%s5971_s15 + $0x38] sm:$0xff] }
 0x533   :  { %v2159_v57 = vsel %vm1094_vm7, %v2157_v1, %v2158_v53  ;;  %v3446_v1 = vld [vmem:[%s5967_s11 + $0x78] sm:$0xff]  ;;  %v3456_v42 = vld [vmem:[%s5967_s11 + $0xb0] sm:$0xff] }
 0x534   :  { %v2175_v60 = vmax.f32 %v2137_v56, %v2159_v57  ;;  %v2141_v62 = vld [vmem:[#allocation5 + $0x28] sm:$0xff]  ;;  %v3141_v6 = vld [vmem:[%s5971_s15 + $0x30] sm:$0xff]  ;;  %v3469_v38 = vld [vmem:[#allocation15] ss:$0 sm:$0xff] }
 0x535   :  { %v2162_v63 = vrot.slane %v2141_v62, 1 }
 0x536   :  { %3431 = vmatprep.mubr.msk.f32.mxu0 %vm191_vm12, %v2175_v60 }
 0x537   :  { %2278 = vmatmul.mubr.f32.vlgmr.msra.gmra.mrb[14].mxu0 %v5586_v47  ;;  %v2163_v5 = vsel %vm1094_vm7, %v2158_v53, %v2162_v63  ;;  %v2167_v7 = vsel %vm1094_vm7, %v2162_v63, %v2166_v58  ;;  %v4045_v53 = vpack.c.bf16 %v3446_v1, %v3445_v50 }
 0x538   :  { %3995 = vmatpush1.bf16.msra.mxu0 %v3994_v61  ;;  %v5607_v8 = vmax.f32 %v2139_v49, %v2163_v5  ;;  %v2179_v15 = vmax.f32 %v2141_v62, %v2167_v7 }
 0x539   :  { %3996 = vmatprep.subr.bf16.mxu0 %v4446_v40 }
 0x53a   :  { %3432 = vmatprep.mubr.msk.f32.mxu0 %vm191_vm12, %v5607_v8 }
 0x53b   :  { %2283 = vmatmul.mubr.f32.gmra.mrb[16].mxu0 %v5588_v48 }
 0x53c   :  { %3998 = vmatpush1.bf16.msra.mxu0 %v3997_v10  ;;  %3433 = vmatprep.mubr.msk.f32.mxu0 %vm191_vm12, %v2179_v15  ;;  %v2400_v10 = vld [vmem:[#allocation14] sm:$0x3] }
 0x53d   :  { %3999 = vmatprep.subr.bf16.mxu0 %v4446_v40 }
 0x53f   :  { %2288 = vmatmul.mubr.f32.gmra.mrb[18].mxu0 %v2178_v21 }
 0x540   :  { %4001 = vmatpush1.bf16.msra.mxu0 %v4000_v20  ;;  %3434 = vmatprep.mubr.msk.f32.mxu0 %vm191_vm12, %v2175_v60  ;;  %v2477_v20 = vld [vmem:[%s5967_s11 + $0x10] sm:$0xff] }
 0x541   :  { %4002 = vmatprep.subr.bf16.mxu0 %v4446_v40 }
 0x544   :  { %4004 = vmatpush1.bf16.msra.mxu0 %v4003_v24  ;;  %v2480_v24 = vld [vmem:[%s5967_s11 + $0x28] sm:$0xff] }
 0x545   :  { %4005 = vmatprep.subr.bf16.mxu0 %v4446_v40  ;;  %v4054_v25 = vpack.c.bf16 %v2480_v24, %v2479_v23  ;;  %v3050_v24 = vld [vmem:[%s5969_s13 + $0x60] sm:$0xff] }
 0x548   :  { %4007 = vmatpush1.bf16.msra.mxu0 %v4006_v29  ;;  %v2482_v29 = vld [vmem:[%s5967_s11 + $0x38] sm:$0xff] }
 0x549   :  { %4008 = vmatprep.subr.bf16.mxu0 %v4446_v40  ;;  %v4057_v28 = vpack.c.bf16 %v2482_v29, %v2481_v26  ;;  %v3052_v29 = vld [vmem:[%s5969_s13 + $0x70] sm:$0xff] }
 0x54c   :  { %4010 = vmatpush1.bf16.msra.mxu0 %v4009_v32  ;;  %v3451_v32 = vld [vmem:[%s5967_s11 + $0x88] sm:$0xff] }
 0x54d   :  { %4011 = vmatprep.subr.bf16.mxu0 %v4446_v40  ;;  %v4063_v33 = vpack.c.bf16 %v3451_v32, %v3450_v31  ;;  %v3136_v31 = vld [vmem:[%s5971_s15 + $0x8] sm:$0xff]  ;;  %v3137_v32 = vld [vmem:[%s5971_s15 + $0x10] sm:$0xff] }
 0x550   :  { %4013 = vmatpush1.bf16.msra.mxu0 %v4012_v34  ;;  %v3453_v34 = vld [vmem:[%s5967_s11 + $0x98] sm:$0xff] }
 0x551   :  { %4014 = vmatprep.subr.bf16.mxu0 %v4446_v40 }
 0x554   :  { %4016 = vmatpush1.bf16.msra.mxu0 %v4015_v52  ;;  %v4066_v52 = vpack.c.bf16 %v3453_v34, %v3452_v9  ;;  %v3138_v9 = vld [vmem:[%s5971_s15 + $0x18] sm:$0xff] }
 0x555   :  { %4017 = vmatprep.subr.bf16.mxu0 %v4446_v40  ;;  %v4114_v34 = vpack.c.bf16 %v3138_v9, %v3137_v32 }
 0x558   :  { %4019 = vmatpush1.bf16.msra.mxu0 %v4018_v30 }
 0x559   :  { %4020 = vmatprep.subr.bf16.mxu0 %v4446_v40 }
 0x55c   :  { %4022 = vmatpush1.bf16.msra.mxu0 %v4021_v37  ;;  %v2714_v37 = vld [vmem:[#allocation14 + $0x4] sm:$0x3] }
 0x55d   :  { %4023 = vmatprep.subr.bf16.mxu0 %v4446_v40 }
 0x560   :  { %4025 = vmatpush1.bf16.msra.mxu0 %v4024_v13  ;;  %v2872_v13 = vld [vmem:[#allocation14 + $0x6] sm:$0x3] }
 0x561   :  { %4026 = vmatprep.subr.bf16.mxu0 %v4446_v40 }
 0x564   :  { %4028 = vmatpush1.bf16.msra.mxu0 %v4027_v18  ;;  %v3463_v18 = vld [vmem:[%s5967_s11 + $0xd8] sm:$0xff] }
 0x565   :  { %4035 = vmatprep.subr.bf16.mxu0 %v4446_v40  ;;  %v4081_v41 = vpack.c.bf16 %v3463_v18, %v3462_v39 }
 0x567   :  { %2382 = vmatmul.mubr.f32.vlgmr.msra.gmra.mrb[20].mxu0 %v5586_v47  ;;  %v3443_v47 = vld [vmem:[%s5967_s11 + $0x60] sm:$0xff] }
 0x568   :  { %3435 = vmatprep.mubr.msk.f32.mxu0 %vm191_vm12, %v5607_v8  ;;  %4037 = vmatpush3.bf16.msra.mxu0 %v4036_v43  ;;  %v3457_v43 = vld [vmem:[%s5967_s11 + $0xb8] sm:$0xff] }
 0x569   :  { %4038 = vmatprep.subr.bf16.mxu0 %v4446_v40  ;;  %v4072_v44 = vpack.c.bf16 %v3457_v43, %v3456_v42  ;;  %v3145_v43 = vld [vmem:[%s5971_s15 + $0x50] sm:$0xf] }
 0x56b   :  { %2387 = vmatmul.mubr.f32.gmra.mrb[22].mxu0 %v5588_v48  ;;  %v3444_v48 = vld [vmem:[%s5967_s11 + $0x68] sm:$0xff] }
 0x56c   :  { %3436 = vmatprep.mubr.msk.f32.mxu0 %vm191_vm12, %v2179_v15  ;;  %4040 = vmatpush3.bf16.msra.mxu0 %v4039_v46  ;;  %v4042_v49 = vpack.c.bf16 %v3444_v48, %v3443_v47  ;;  %v2484_v15 = vld [vmem:[#allocation14 + $0x2] sm:$0x3]  ;;  %v3465_v46 = vld [vmem:[%s5967_s11 + $0xe8] sm:$0xff] }
 0x56d   :  { %4041 = vmatprep.subr.bf16.mxu0 %v4446_v40  ;;  %v4084_v47 = vpack.c.bf16 %v3465_v46, %v3464_v45  ;;  %v3466_v48 = vld [vmem:[%s5967_s11 + $0xf0] sm:$0xff] }
 0x56f   :  { %2392 = vmatmul.mubr.f32.gmra.mrb[24].mxu0 %v2178_v21  ;;  %v2478_v21 = vld [vmem:[%s5967_s11 + $0x18] sm:$0xff] }
 0x570   :  { %3622 = vmatprep.mubr.msk.f32.mxu0 %vm4447_vm8, %v4444_v0  ;;  %4043 = vmatpush3.bf16.msra.mxu0 %v4042_v49  ;;  %v4051_v22 = vpack.c.bf16 %v2478_v21, %v2477_v20  ;;  %v3467_v49 = vld [vmem:[%s5967_s11 + $0xf8] sm:$0xff]  ;;  %v3048_v21 = vld [vmem:[%s5969_s13 + $0x50] sm:$0xff] }
 0x571   :  { %4044 = vmatprep.subr.bf16.mxu0 %v4446_v40  ;;  %v4087_v50 = vpack.c.bf16 %v3467_v49, %v3466_v48  ;;  %v3472_v49 = vld [vmem:[#allocation18] ss:$0 sm:$0xff] }
 0x574   :  { %4046 = vmatpush3.bf16.msra.mxu0 %v4045_v53 }
 0x575   :  { %4059 = vmatprep.subr.bf16.mxu0 %v4446_v40 }
 0x60a   :  { %v2279_v54 = vpop.f32.mrb[14].mxu0 }
 0x60b   :  { %v2281_v55 = vpop.f32.mrb[15].mxu0 }
 0x60e   :  { %v2284_v56 = vpop.f32.mrb[16].mxu0 }
 0x60f   :  { %v2286_v57 = vpop.f32.mrb[17].mxu0 }
 0x610   :  { %v3038_v57 = vld [vmem:[%s5969_s13] sm:$0xff] }
 0x612   :  { %v2289_v58 = vpop.f32.mrb[18].mxu0 }
 0x613   :  { %v2291_v59 = vpop.f32.mrb[19].mxu0 }
 0x63a   :  { %v2383_v60 = vpop.f32.mrb[20].mxu0 }
 0x63b   :  { %v2397_v61 = vmax.f32 %v2279_v54, %v2383_v60  ;;  %v2385_v62 = vpop.f32.mrb[21].mxu0  ;;  %v3040_v60 = vld [vmem:[%s5969_s13 + $0x10] sm:$0xff] }
 0x63e   :  { %v2388_v63 = vpop.f32.mrb[22].mxu0 }
 0x63f   :  { %v2398_v2 = vmax.f32 %v2284_v56, %v2388_v63  ;;  %v2390_v3 = vpop.f32.mrb[23].mxu0 }
 0x640   :  { %v3042_v3 = vld [vmem:[%s5969_s13 + $0x20] sm:$0xff] }
 0x641   :  { %v5722_v4 = vpack.c.bf16 %v2398_v2, %v2397_v61  ;;  %v3041_v61 = vld [vmem:[%s5969_s13 + $0x18] sm:$0xff] }
 0x642   :  { %v2393_v5 = vpop.f32.mrb[24].mxu0  ;;  %v4093_v2 = vpack.c.bf16 %v3041_v61, %v3040_v60 }
 0x643   :  { %v5724_v7 = vmax.f32 %v2289_v58, %v2393_v5  ;;  %v2395_v8 = vpop.f32.mrb[25].mxu0  ;;  %4031 = vmatpush3.bf16.msra.mxu1 %v5722_v4  ;;  %v3039_v58 = vld [vmem:[%s5969_s13 + $0x8] sm:$0xff] }
 0x644   :  { %3592 = vmatprep.subr.mxu1 %v4444_v0  ;;  %v4090_v59 = vpack.c.bf16 %v3039_v58, %v3038_v57 }
 0x647   :  { %3593 = vmatpush3.msra.mxu1 %v5724_v7 }
 0x648   :  { %4032 = vmatprep.subr.bf16.mxu1 %v4446_v40  ;;  %3595 = vmatmul.mubr.msk.f32.vlgmr.msra.gmra.mrb[40].mxu1 %vm2401_vm14, %v2400_v10  ;;  %v3044_v10 = vld [vmem:[%s5969_s13 + $0x30] sm:$0xff] }
 0x649   :  { %4034 = vmatpush3.bf16.msra.mxu1 %v5722_v4  ;;  %3603 = vmatprep.mubr.msk.f32.mxu1 %vm4447_vm8, %v4444_v0  ;;  %v4099_v12 = vpack.c.bf16 %v3045_v11, %v3044_v10 }
 0x64a   :  { %3601 = vmatprep.subr.mxu1 %v4444_v0 }
 0x64d   :  { %3602 = vmatpush3.msra.mxu1 %v5724_v7 }
 0x64e   :  { %3604 = vmatmul.mubr.msk.f32.vlgmr.msra.gmra.mrb[42].mxu1 %vm2401_vm14, %v2484_v15  ;;  %4047 = vmatprep.subr.bf16.mxu1 %v4446_v40  ;;  %v3046_v15 = vld [vmem:[%s5969_s13 + $0x40] sm:$0xff] }
 0x64f   :  { %4049 = vmatpush3.bf16.msra.mxu1 %v4048_v19  ;;  %3641 = vmatprep.mubr.msk.f32.mxu1 %vm4447_vm8, %v4444_v0  ;;  %v3047_v19 = vld [vmem:[%s5969_s13 + $0x48] sm:$0xff] }
 0x650   :  { %4050 = vmatprep.subr.bf16.mxu1 %v4446_v40  ;;  %v4102_v20 = vpack.c.bf16 %v3047_v19, %v3046_v15 }
 0x653   :  { %4052 = vmatpush3.bf16.msra.mxu1 %v4051_v22  ;;  %v3049_v22 = vld [vmem:[%s5969_s13 + $0x58] sm:$0xff] }
 0x654   :  { %4053 = vmatprep.subr.bf16.mxu1 %v4446_v40  ;;  %v4105_v23 = vpack.c.bf16 %v3049_v22, %v3048_v21 }
 0x657   :  { %4055 = vmatpush3.bf16.msra.mxu1 %v4054_v25  ;;  %v3051_v25 = vld [vmem:[%s5969_s13 + $0x68] sm:$0xff] }
 0x658   :  { %4056 = vmatprep.subr.bf16.mxu1 %v4446_v40  ;;  %v4108_v26 = vpack.c.bf16 %v3051_v25, %v3050_v24 }
 0x65b   :  { %4058 = vmatpush3.bf16.msra.mxu1 %v4057_v28  ;;  %v3135_v28 = vld [vmem:[%s5971_s15] sm:$0xff] }
 0x65c   :  { %4062 = vmatprep.subr.bf16.mxu1 %v4446_v40 }
 0x71b   :  { %v2471_v35 = vpop.f32.mrb[40].mxu1 }
 0x71c   :  { %v3596_v51 = vpop.f32.mrb[41].mxu1  ;;  %3642 = vmatmul.mubr.msk.f32.vlgmr.msra.gmra.mrb[44].mxu1 %vm191_vm12, %v2471_v35  ;;  %v3139_v35 = vld [vmem:[%s5971_s15 + $0x20] sm:$0xff] }
 0x71d   :  { %4064 = vmatpush3.bf16.msra.mxu1 %v4063_v33  ;;  %3669 = vmatprep.mubr.msk.f32.mxu1 %vm4447_vm8, %v4444_v0  ;;  %v4111_v33 = vpack.c.bf16 %v3136_v31, %v3135_v28  ;;  %v3140_v51 = vld [vmem:[%s5971_s15 + $0x28] sm:$0xff] }
 0x71e   :  { %4065 = vmatprep.subr.bf16.mxu1 %v4446_v40 }
 0x721   :  { %v2554_v30 = vpop.f32.mrb[42].mxu1  ;;  %4067 = vmatpush3.bf16.msra.mxu1 %v4066_v52  ;;  %v4117_v52 = vpack.c.bf16 %v3140_v51, %v3139_v35 }
 0x722   :  { %3623 = vmatmul.mubr.msk.f32.vlgmr.msra.gmra.mrb[26].mxu0 %vm191_vm12, %v2554_v30  ;;  %v3605_v17 = vpop.f32.mrb[43].mxu1  ;;  %4068 = vmatprep.subr.bf16.mxu1 %v4446_v40  ;;  %v4120_v30 = vpack.c.bf16 %v3142_v27, %v3141_v6 }
 0x723   :  { %4061 = vmatpush3.bf16.msra.mxu0 %v5722_v4  ;;  %3650 = vmatprep.mubr.msk.f32.mxu0 %vm4447_vm8, %v4444_v0 }
 0x724   :  { %3648 = vmatprep.subr.mxu0 %v4444_v0 }
 0x725   :  { %4070 = vmatpush3.bf16.msra.mxu1 %v4069_v36 }
 0x726   :  { %4071 = vmatprep.subr.bf16.mxu1 %v4446_v40 }
 0x727   :  { %3649 = vmatpush3.msra.mxu0 %v5724_v7 }
 0x728   :  { %3651 = vmatmul.mubr.msk.f32.vlgmr.msra.gmra.mrb[28].mxu0 %vm2401_vm14, %v2714_v37  ;;  %4074 = vmatprep.subr.bf16.mxu0 %v4446_v40 }
 0x729   :  { %4076 = vmatpush3.bf16.msra.mxu0 %v5722_v4  ;;  %3678 = vmatprep.mubr.msk.f32.mxu0 %vm4447_vm8, %v4444_v0  ;;  %v3043_v4 = vld [vmem:[%s5969_s13 + $0x28] sm:$0xff] }
 0x72a   :  { %3676 = vmatprep.subr.mxu0 %v4444_v0  ;;  %4073 = vmatpush3.bf16.msra.mxu1 %v4072_v44  ;;  %v3470_v44 = vld [vmem:[#allocation17] ss:$0 sm:$0xff] }
 0x72b   :  { %4089 = vmatprep.subr.bf16.mxu1 %v4446_v40 }
 0x72d   :  { %3677 = vmatpush3.msra.mxu0 %v5724_v7  ;;  %v4096_v7 = vpack.c.bf16 %v3043_v4, %v3042_v3 }
 0x72e   :  { %3679 = vmatmul.mubr.msk.f32.vlgmr.msra.gmra.mrb[30].mxu0 %vm2401_vm14, %v2872_v13  ;;  %4077 = vmatprep.subr.bf16.mxu0 %v4446_v40 }
 0x72f   :  { %4079 = vmatpush3.bf16.msra.mxu0 %v4078_v16  ;;  %3697 = vmatprep.mubr.msk.f32.mxu0 %vm4447_vm8, %v4444_v0 }
 0x730   :  { %4080 = vmatprep.subr.bf16.mxu0 %v4446_v40 }
 0x733   :  { %4082 = vmatpush3.bf16.msra.mxu0 %v4081_v41  ;;  %v3143_v41 = vld [vmem:[%s5971_s15 + $0x40] sm:$0xff] }
 0x734   :  { %4083 = vmatprep.subr.bf16.mxu0 %v4446_v40 }
 0x737   :  { %4085 = vmatpush3.bf16.msra.mxu0 %v4084_v47 }
 0x738   :  { %4086 = vmatprep.subr.bf16.mxu0 %v4446_v40 }
 0x73b   :  { %4088 = vmatpush3.bf16.msra.mxu0 %v4087_v50 }
 0x73c   :  { %4110 = vmatprep.subr.bf16.mxu0 %v4446_v40 }
 0x7ef   :  { %v2709_v1 = vpop.f32.mrb[44].mxu1 }
 0x7f0   :  { %v3643_v53 = vpop.f32.mrb[45].mxu1 }
 0x7f5   :  { %v2636_v54 = vpop.f32.mrb[26].mxu0 }
 0x7f6   :  { %v5844_v55 = vadd.f32 %v2709_v1, %v2636_v54  ;;  %v3624_v56 = vpop.f32.mrb[27].mxu0 }
 0x7fb   :  { %v2784_v62 = vpop.f32.mrb[28].mxu0 }
 0x7fc   :  { %3670 = vmatmul.mubr.msk.f32.vlgmr.msra.gmra.mrb[46].mxu1 %vm191_vm12, %v2784_v62  ;;  %v3652_v63 = vpop.f32.mrb[29].mxu0 }
 0x7fd   :  { %4091 = vmatpush3.bf16.msra.mxu1 %v4090_v59  ;;  %3730 = vmatprep.mubr.msk.f32.mxu1 %vm4447_vm8, %v4444_v0 }
 0x7fe   :  { %4092 = vmatprep.subr.bf16.mxu1 %v4446_v40 }
 0x801   :  { %v2942_v5 = vpop.f32.mrb[30].mxu0  ;;  %4094 = vmatpush3.bf16.msra.mxu1 %v4093_v2 }
 0x802   :  { %3698 = vmatmul.mubr.msk.f32.vlgmr.msra.gmra.mrb[32].mxu0 %vm191_vm12, %v2942_v5  ;;  %v3680_v8 = vpop.f32.mrb[31].mxu0  ;;  %4095 = vmatprep.subr.bf16.mxu1 %v4446_v40 }
 0x803   :  { %3755 = vmatprep.mubr.msk.f32.mxu0 %vm4447_vm8, %v4444_v0  ;;  %4112 = vmatpush3.bf16.msra.mxu0 %v4111_v33 }
 0x804   :  { %4113 = vmatprep.subr.bf16.mxu0 %v4446_v40 }
 0x805   :  { %4097 = vmatpush3.bf16.msra.mxu1 %v4096_v7 }
 0x806   :  { %4098 = vmatprep.subr.bf16.mxu1 %v4446_v40 }
 0x807   :  { %4115 = vmatpush3.bf16.msra.mxu0 %v4114_v34 }
 0x808   :  { %4116 = vmatprep.subr.bf16.mxu0 %v4446_v40 }
 0x809   :  { %4100 = vmatpush3.bf16.msra.mxu1 %v4099_v12 }
 0x80a   :  { %4101 = vmatprep.subr.bf16.mxu1 %v4446_v40 }
 0x80b   :  { %4118 = vmatpush3.bf16.msra.mxu0 %v4117_v52 }
 0x80c   :  { %4119 = vmatprep.subr.bf16.mxu0 %v4446_v40 }
 0x80d   :  { %4103 = vmatpush3.bf16.msra.mxu1 %v4102_v20 }
 0x80e   :  { %4104 = vmatprep.subr.bf16.mxu1 %v4446_v40 }
 0x80f   :  { %4121 = vmatpush3.bf16.msra.mxu0 %v4120_v30 }
 0x810   :  { %4122 = vmatprep.subr.bf16.mxu0 %v4446_v40 }
 0x811   :  { %4106 = vmatpush3.bf16.msra.mxu1 %v4105_v23 }
 0x812   :  { %4107 = vmatprep.subr.bf16.mxu1 %v4446_v40  ;;  %v3144_v40 = vld [vmem:[%s5971_s15 + $0x48] sm:$0xff] }
 0x813   :  { %v4123_v42 = vpack.c.bf16 %v3144_v40, %v3143_v41 }
 0x815   :  { %4109 = vmatpush3.bf16.msra.mxu1 %v4108_v26  ;;  %4124 = vmatpush3.bf16.msra.mxu0 %v4123_v42 }
 0x816   :  { %3728 = vmatprep.subr.mxu1 %v4444_v0  ;;  %3753 = vmatprep.subr.mxu0 %v4444_v0 }
 0x819   :  { %3729 = vmatpush3.msra.mxu1 %v3052_v29  ;;  %3754 = vmatpush3.msk.msra.mxu0 %vm266_vm2, %v3145_v43 }
 0x8cf   :  { %v2866_v36 = vpop.f32.mrb[46].mxu1 }
 0x8d0   :  { %v2870_v17 = vadd.f32 %v2866_v36, %v5844_v55  ;;  %v3671_v37 = vpop.f32.mrb[47].mxu1 }
 0x8d5   :  { %v3024_v14 = vpop.f32.mrb[32].mxu0 }
 0x8d6   :  { %v3028_v13 = vadd.f32 %v3024_v14, %v2870_v17  ;;  %v3699_v16 = vpop.f32.mrb[33].mxu0 }
 0x8d8   :  { %v3036_v39 = vadd.f32 %v3469_v38, %v3028_v13 }
 0x8da   :  { %v3037_v18 = vmax.f32 %v3036_v39, 0.0 }
 0x8dc   :  { %3731 = vmatmul.mubr.msk.f32.vlgmr.msra.gmra.mrb[48].mxu1 %vm3060_vm15, %v3037_v18 }
 0x9af   :  { %v3130_v45 = vpop.f32.mrb[48].mxu1 }
 0x9b0   :  { %v3131_v46 = vadd.f32 %v3470_v44, %v3130_v45  ;;  %v3732_v47 = vpop.f32.mrb[49].mxu1 }
 0x9b2   :  { %v3134_v48 = vmax.f32 %v3131_v46, 0.0 }
 0x9b4   :  { %3756 = vmatmul.mubr.msk.f32.vlgmr.msra.gmra.mrb[34].mxu0 %vm3153_vm0, %v3134_v48 }
 0xa87   :  { %v3226_v50 = vpop.f32.mrb[34].mxu0 }
 0xa88   :  { %v3227_v1 = vadd.f32 %v3472_v49, %v3226_v50  ;;  %v3757_v53 = vpop.f32.mrb[35].mxu0 }
 0xa8a   :  { %3230 = vst [vmem:[#allocation20] sm:$0x3] %v3227_v1 }
 0xa8b   :  { %4409 = shalt.err (!%p4406_p12)
}
 0xa8c   :  { %s4410_s21 = scalar_lea.hbm %s5973_s17, 32 }
 0xa8d   :  { %p4411_p13 = scmp.ne.s32.totalorder %s5973_s17, %s4410_s21  ;;  %p4414_p0 = scmp.lt.u32.totalorder %s4410_s21, %s5973_s17 }
 0xa8f   :  { %p4416_p1 = pnand %p4414_p0, %p4411_p13 }
 0xa91   :  { %4419 = shalt.err (!%p4416_p1)
}
 0xa92   :  { %3240 = dma.vmem_to_hbm [thread:$0]  %s3238_s24, 32, %s5973_s17, [#allocation8]  }
 0xa93   :  { %4430 = dma.done.wait [#allocation8], 32  }
 0xa94   :  { %4431 = vsyncadd [#allocation8], 4294967264 }
 0xa95   :  { %3244 = vsyncpa [#allocation7], 1 }
 0xa96   :  { %3245 = vsyncpa [#allocation10], 1 }
 0xa97   :  { %3246 = vsyncpa [#allocation13], 1 }
 0xa98   :  { %3247 = vsyncpa [#allocation16], 1 }
 0xa99   :  { %3248 = vsyncpa [#allocation19], 1 }
 0xa9a   :  { %3249 = vsyncpa [#allocation8], 1 }

</bundles_post_ra>
